<compile_context>
chip_gen: v6e
topology: v6e:2x2x1
jax: 0.10.0
libtpu: 0.0.40
codegen_flags: <defaults>
</compile_context>

<pallas_src>
import functools

import jax
import jax.numpy as jnp
from jax import lax
from jax.experimental import pallas as pl
from jax.experimental.pallas import tpu as pltpu

_LANE = 128

# Set to jnp.bfloat16 on v6e/v7x for ~2x MXU throughput on the big fused
# matmul (f32 accumulation kept via preferred_element_type).  Left at f32 so
# the tight correctness check below holds; gram/softmax inputs stay f32 either
# way because they are sliced from the f32 matmul output.
MXU_DTYPE = jnp.float32


def _round_up(v, m):
    return (v + m - 1) // m * m


def _pick_bt(b, cap=8):
    # Largest divisor of b that is <= cap (batch elements per grid step).
    for bt in range(min(b, cap), 0, -1):
        if b % bt == 0:
            return bt
    return 1


@functools.lru_cache(maxsize=None)
def _vmem_limit_bytes():
    # Generation-aware scoped-VMEM limit: ~7/8 of physical VMEM, capped at
    # 112 MiB (v5e/v6e: 128 MiB physical -> 112 MiB; v7x: 64 MiB -> ~56 MiB).
    cap = 128 * 1024 * 1024
    try:
        info = pltpu.get_tpu_info()
        for name in ("vmem_capacity_bytes", "vmem_bytes", "vmem_size_bytes"):
            v = getattr(info, name, None)
            if v:
                cap = int(v)
                break
    except Exception:
        pass
    return max(32 * 1024 * 1024, min(cap * 7 // 8, 112 * 1024 * 1024))


# ----------------------------------------------------------------------------
# Fused kernel (Bt batch elements per grid step).
#
# Layout: the spatially padded image (C, Hp, Wp) is flattened onto the lane
# axis and placed at a 128-aligned offset halo_L inside xpp (length Lpp, also
# a multiple of 128).  Padded-flat index p = (y+3)*Wp + (x+3) addresses pixel
# (y, x); a conv tap (dy, dx) is a static flat shift of (dy-3)*Wp + (dx-3).
# The matmul runs on a 128-aligned window of length Le = Lc + 2*hb starting at
# xpp index QB = 128; the image start sits at window offset co = hb (aligned).
# ----------------------------------------------------------------------------
def fused_spin_kernel(Wp, xpp_ref, mask_ref, wcat_ref, bsi_ref, ba_ref,
                      out_ref, xsh_ref):
    # xpp_ref : (Bt, C, Lpp)  halo-padded flattened input (MXU_DTYPE)
    # mask_ref: (1, Lc)       1.0 at valid interior pixels, 0.0 elsewhere
    # wcat_ref: (2C+7, 7C)    [spatial_proj | fused inter+reverse | 49 attn taps]
    # bsi_ref : (2C, 1)       [spatial_proj bias ; fused inter+reverse bias]
    # ba_ref  : (1,) in SMEM  scalar attention-conv bias
    # out_ref : (Bt, C, Lc)
    # xsh_ref : (7C, Le)      scratch: dx-shifted input stack (MXU_DTYPE)
    Bt, C, Lpp = xpp_ref.shape
    Lc = out_ref.shape[2]
    Le = xsh_ref.shape[1]
    hb = _round_up(3 * Wp + 3, _LANE)   # static; Le == Lc + 2*hb
    QB = _LANE                          # xpp index of matmul-window origin
    co = hb                             # window offset of the image start (aligned)

    # Hoisted invariants (loaded once per grid step, reused for all Bt).
    maskf = mask_ref[...]               # (1, Lc)
    bsp = bsi_ref[0:C, :]               # (C, 1)
    bir = bsi_ref[C:2 * C, :]           # (C, 1)
    ba = ba_ref[0]                      # scalar, from SMEM
    wcat = wcat_ref[...]                # (2C+7, 7C)

    for b in range(Bt):                 # Bt is small and static (unrolled)
        x_pp = xpp_ref[b]               # (C, Lpp)

        # dx-shifted stack: block dx holds the input shifted by (dx-3) lanes.
        # Only these 6 small lane shifts (full-C rows) touch the XLU; the dy
        # shifts below become 7 single-row slices of the matmul output.
        for dx in range(7):
            xsh_ref[dx * C:(dx + 1) * C, :] = \
                x_pp[:, QB + dx - 3:QB + dx - 3 + Le]

        # ONE MXU matmul for spatial_proj, inter+reverse and all 49 conv taps.
        M = jnp.dot(wcat, xsh_ref[...],
                    preferred_element_type=jnp.float32)        # (2C+7, Le)

        # 1x1 convs: aligned central-window slices (co is a multiple of 128).
        sp = (M[0:C, co:co + Lc] + bsp) * maskf                 # (C, Lc)
        inter = M[C:2 * C, co:co + Lc] + bir                    # (C, Lc)

        # gram = sp @ sp^T over the spatial axis, softmax, re-projection.
        gram = lax.dot_general(sp, sp, (((1,), (1,)), ((), ())),
                               preferred_element_type=jnp.float32)  # (C, C)
        gram = gram - jnp.max(gram, axis=-1, keepdims=True)
        e = jnp.exp(gram)
        norm = e * pl.reciprocal(jnp.sum(e, axis=-1, keepdims=True),
                                 approx=True)                   # (C, C)
        sp_proj = jnp.dot(norm, sp,
                          preferred_element_type=jnp.float32)   # (C, Lc)

        # 7x7 attention conv: the dy taps are 7 row-shifted slices of M,
        # tree-added (independent partial sums, no 49-long serial chain).
        rows = [M[2 * C + dy:2 * C + dy + 1,
                  co + (dy - 3) * Wp:co + (dy - 3) * Wp + Lc]
                for dy in range(7)]
        acc = ((rows[0] + rows[1]) + (rows[2] + rows[3])) \
            + ((rows[4] + rows[5]) + rows[6])                   # (1, Lc)
        attn = jax.nn.sigmoid(acc + ba)

        out_ref[b] = sp_proj * attn + inter


# ----------------------------------------------------------------------------
# Wrapper
# ----------------------------------------------------------------------------
@jax.jit
def spin_forward(x, params):
    B, C, H, W = x.shape
    Hp, Wp = H + 6, W + 6
    Lp = Hp * Wp
    Lc = _round_up(Lp, _LANE)            # lane-dense compute length
    hb = _round_up(3 * Wp + 3, _LANE)    # halo rounded to whole lane blocks
    halo_L = hb + _LANE                  # image start offset (multiple of 128)
    Le = Lc + 2 * hb                     # extended matmul window (mult of 128)
    Lpp = Le + 2 * _LANE                 # total padded-flat length (mult of 128)

    # Spatial zero-pad (for the 7x7 conv), flatten, add 128-aligned flat halos
    # and tail zeros.  The pad -> reshape -> pad chain is a trivially fusible
    # copy fusion for XLA.
    # TODO(synk): if profiling shows the two pads unfused, build xpp with a
    # single dynamic_update_slice into a zeros buffer instead.
    xpad = jnp.pad(x, ((0, 0), (0, 0), (3, 3), (3, 3))).reshape(B, C, Lp)
    xpp = jnp.pad(xpad, ((0, 0), (0, 0), (halo_L, Lpp - Lp - halo_L)))
    xpp = xpp.astype(MXU_DTYPE)

    # Validity mask in padded-flat coordinates (shared across batch).
    j = jnp.arange(Lc)
    r, c = j // Wp, j % Wp
    mask = (((r >= 3) & (r < 3 + H) & (c >= 3) & (c < 3 + W))
            .astype(jnp.float32).reshape(1, Lc))

    # Algebraic fusion of inter_proj + reverse_proj (exact up to f32 rounding).
    w_ir = params["rev_w"] @ params["int_w"]                       # (C, C)
    b_ir = params["rev_w"] @ params["int_b"] + params["rev_b"]     # (C,)

    # One concatenated LHS over the dx-stacked RHS (contraction dim 7C):
    #   rows [0,  C)    : spatial_proj   (lives in the unshifted dx=3 block)
    #   rows [C,  2C)   : fused inter+reverse (dx=3 block)
    #   rows [2C, 2C+7) : attention taps, row dy over all (dx, c)
    # TODO(synk): for large C (7C >> 128) split the attention rows into their
    # own (7, 7C) matmul to avoid the zero-padded contraction on the 1x1 rows.
    wcat = jnp.zeros((2 * C + 7, 7 * C), jnp.float32)
    wcat = wcat.at[0:C, 3 * C:4 * C].set(params["sp_w"])
    wcat = wcat.at[C:2 * C, 3 * C:4 * C].set(w_ir)
    wa = jnp.transpose(params["attn_w"][0], (1, 2, 0)).reshape(7, 7 * C)
    wcat = wcat.at[2 * C:2 * C + 7, :].set(wa)
    wcat = wcat.astype(MXU_DTYPE)

    bsi = jnp.concatenate([params["sp_b"], b_ir]).reshape(2 * C, 1)
    ba = params["attn_b"].astype(jnp.float32).reshape(1)

    Bt = _pick_bt(B)                     # batch elements per grid step

    out_flat = pl.pallas_call(
        functools.partial(fused_spin_kernel, Wp),
        out_shape=jax.ShapeDtypeStruct((B, C, Lc), jnp.float32),
        grid=(B // Bt,),
        in_specs=[
            pl.BlockSpec((Bt, C, Lpp), lambda g: (g, 0, 0)),
            pl.BlockSpec((1, Lc), lambda g: (0, 0)),
            pl.BlockSpec((2 * C + 7, 7 * C), lambda g: (0, 0)),
            pl.BlockSpec((2 * C, 1), lambda g: (0, 0)),
            pl.BlockSpec((1,), lambda g: (0,),
                         memory_space=pltpu.MemorySpace.SMEM),
        ],
        out_specs=pl.BlockSpec((Bt, C, Lc), lambda g: (g, 0, 0)),
        scratch_shapes=[pltpu.VMEM((7 * C, Le), MXU_DTYPE)],
        compiler_params=pltpu.CompilerParams(
            dimension_semantics=("parallel",),
            vmem_limit_bytes=_vmem_limit_bytes()),
        # TODO(synk): on v7x use CORE_PARALLEL on the batch axis (2 TCs/chip),
        # and for very large C*H*W add a lane-tile grid axis with a (C, C)
        # gram VMEM accumulator (two-pass) instead of the monolithic block.
    )(xpp, mask, wcat, bsi, ba)

    # Un-flatten: drop the lane tail, reshape to the padded grid, crop the ring.
    # TODO(synk): emit a compact (C, round_up(H*W, 128)) layout directly from
    # the kernel if this crop shows up unfused in a profile.
    out = out_flat[:, :, :Lp].reshape(B, C, Hp, Wp)[:, :, 3:3 + H, 3:3 + W]
    return out


# ----------------------------------------------------------------------------
# Pure-JAX reference (for correctness check)
# ----------------------------------------------------------------------------
def spin_reference(x, params):
    B, C, H, W = x.shape
    HW = H * W

    def conv1x1(y, w, b):
        return jnp.einsum('oc,bchw->bohw', w, y) + b[None, :, None, None]

    spatial_out = conv1x1(x, params["sp_w"], params["sp_b"])
    spatial_flat = spatial_out.reshape(B, C, HW)
    gram = jnp.einsum('bcs,bds->bcd', spatial_flat, spatial_flat)
    spatial_norm = jax.nn.softmax(gram, axis=-1)
    spatial_proj = jnp.einsum('bcd,bds->bcs', spatial_norm,
                              spatial_flat).reshape(B, C, H, W)

    inter = conv1x1(x, params["int_w"], params["int_b"])
    inter = conv1x1(inter, params["rev_w"], params["rev_b"])

    attn = lax.conv_general_dilated(
        x, params["attn_w"], window_strides=(1, 1), padding=((3, 3), (3, 3)),
        dimension_numbers=('NCHW', 'OIHW', 'NCHW'))
    attn = jax.nn.sigmoid(attn + params["attn_b"][None, :, None, None])
    return spatial_proj * attn + inter


# ----------------------------------------------------------------------------
# Deterministic parameter init (synthetic; not a checkpoint load)
# ----------------------------------------------------------------------------
def init_params(key, C):
    ks = jax.random.split(key, 8)
    scale_1x1 = 1.0 / jnp.sqrt(C)
    scale_7x7 = 1.0 / jnp.sqrt(C * 49)
    return {
        "sp_w": scale_1x1 * jax.random.normal(ks[0], (C, C), jnp.float32),
        "sp_b": 0.1 * jax.random.normal(ks[1], (C,), jnp.float32),
        "int_w": scale_1x1 * jax.random.normal(ks[2], (C, C), jnp.float32),
        "int_b": 0.1 * jax.random.normal(ks[3], (C,), jnp.float32),
        "rev_w": scale_1x1 * jax.random.normal(ks[4], (C, C), jnp.float32),
        "rev_b": 0.1 * jax.random.normal(ks[5], (C,), jnp.float32),
        "attn_w": scale_7x7 * jax.random.normal(ks[6], (1, C, 7, 7), jnp.float32),
        "attn_b": 0.1 * jax.random.normal(ks[7], (1,), jnp.float32),
    }


if __name__ == "__main__":
    B, C, H, W = 2, 4, 16, 16
    key = jax.random.PRNGKey(0)
    kx, kp = jax.random.split(key)
    x = jax.random.normal(kx, (B, C, H, W), jnp.float32)
    params = init_params(kp, C)

    out = jax.block_until_ready(spin_forward(x, params))
    ref = spin_reference(x, params)

    assert out.shape == (B, C, H, W)
    err = jnp.max(jnp.abs(out - ref))
    # Tolerance budget: the EUP approximate reciprocal on the softmax
    # denominator (requested perf change) plus the algebraically folded
    # inter+reverse 1x1 convs; with approx=False the kernel matches the
    # reference to ~1e-5 at these shapes.
    assert jnp.allclose(out, ref, atol=2e-2, rtol=2e-2), \
        f"max abs err {err}"

    print("KERNEL_OK")
</pallas_src>

<mosaic_0001>
module attributes {stable_mosaic.version = 11 : i64} {
  func.func @fused_spin_kernel(%arg0: i32, %arg1: memref<2x4x1024xf32, #tpu.memory_space<vmem>>, %arg2: memref<1x512xf32, #tpu.memory_space<vmem>>, %arg3: memref<15x28xf32, #tpu.memory_space<vmem>>, %arg4: memref<8x1xf32, #tpu.memory_space<vmem>>, %arg5: memref<1xf32, #tpu.memory_space<smem>>, %arg6: memref<2x4x512xf32, #tpu.memory_space<vmem>>, %arg7: memref<28x768xf32, #tpu.memory_space<vmem>>) attributes {dimension_semantics = [#tpu.dimension_semantics<parallel>], iteration_bounds = array<i64: 1>, scalar_prefetch = 0 : i64, scratch_operands = 1 : i64, tpu.core_type = #tpu.core_type<tc>, window_params = [{transform_indices = @transform_0, window_bounds = array<i64: 2, 4, 1024>}, {pipeline_mode = #tpu.pipeline_mode<synchronous>, transform_indices = @transform_1, window_bounds = array<i64: 1, 512>}, {pipeline_mode = #tpu.pipeline_mode<synchronous>, transform_indices = @transform_2, window_bounds = array<i64: 15, 28>}, {pipeline_mode = #tpu.pipeline_mode<synchronous>, transform_indices = @transform_3, window_bounds = array<i64: 8, 1>}, {transform_indices = @transform_4, window_bounds = array<i64: 1>}, {transform_indices = @transform_5, window_bounds = array<i64: 2, 4, 512>}]} {
    %c0 = arith.constant 0 : index
    %c0_0 = arith.constant 0 : index
    %0 = vector.load %arg2[%c0, %c0_0] : memref<1x512xf32, #tpu.memory_space<vmem>>, vector<1x512xf32>
    %c0_1 = arith.constant 0 : index
    %c0_2 = arith.constant 0 : index
    %1 = vector.load %arg4[%c0_1, %c0_2] : memref<8x1xf32, #tpu.memory_space<vmem>>, vector<4x1xf32>
    %c4 = arith.constant 4 : index
    %c0_3 = arith.constant 0 : index
    %2 = vector.load %arg4[%c4, %c0_3] : memref<8x1xf32, #tpu.memory_space<vmem>>, vector<4x1xf32>
    %c0_4 = arith.constant 0 : index
    %3 = memref.load %arg5[%c0_4] : memref<1xf32, #tpu.memory_space<smem>>
    %c0_5 = arith.constant 0 : index
    %c0_6 = arith.constant 0 : index
    %4 = vector.load %arg3[%c0_5, %c0_6] : memref<15x28xf32, #tpu.memory_space<vmem>>, vector<15x28xf32>
    %c0_7 = arith.constant 0 : index
    %c0_8 = arith.constant 0 : index
    %c0_9 = arith.constant 0 : index
    %5 = vector.load %arg1[%c0_7, %c0_8, %c0_9] : memref<2x4x1024xf32, #tpu.memory_space<vmem>>, vector<1x4x1024xf32>
    %6 = vector.shape_cast %5 : vector<1x4x1024xf32> to vector<4x1024xf32>
    %7 = vector.extract_strided_slice %6 {offsets = [0, 125], sizes = [4, 768], strides = [1, 1]} : vector<4x1024xf32> to vector<4x768xf32>
    %c0_10 = arith.constant 0 : index
    %c0_11 = arith.constant 0 : index
    %8 = vector.load %arg7[%c0_10, %c0_11] : memref<28x768xf32, #tpu.memory_space<vmem>>, vector<4x768xf32>
    tpu.vector_store %arg7[%c0_10, %c0_11], %7 {strides = array<i32>} : memref<28x768xf32, #tpu.memory_space<vmem>>, vector<4x768xf32>,
    %9 = vector.extract_strided_slice %6 {offsets = [0, 126], sizes = [4, 768], strides = [1, 1]} : vector<4x1024xf32> to vector<4x768xf32>
    %c4_12 = arith.constant 4 : index
    %c0_13 = arith.constant 0 : index
    %10 = vector.load %arg7[%c4_12, %c0_13] : memref<28x768xf32, #tpu.memory_space<vmem>>, vector<4x768xf32>
    tpu.vector_store %arg7[%c4_12, %c0_13], %9 {strides = array<i32>} : memref<28x768xf32, #tpu.memory_space<vmem>>, vector<4x768xf32>,
    %11 = vector.extract_strided_slice %6 {offsets = [0, 127], sizes = [4, 768], strides = [1, 1]} : vector<4x1024xf32> to vector<4x768xf32>
    %c8 = arith.constant 8 : index
    %c0_14 = arith.constant 0 : index
    %12 = vector.load %arg7[%c8, %c0_14] : memref<28x768xf32, #tpu.memory_space<vmem>>, vector<4x768xf32>
    tpu.vector_store %arg7[%c8, %c0_14], %11 {strides = array<i32>} : memref<28x768xf32, #tpu.memory_space<vmem>>, vector<4x768xf32>,
    %13 = vector.extract_strided_slice %6 {offsets = [0, 128], sizes = [4, 768], strides = [1, 1]} : vector<4x1024xf32> to vector<4x768xf32>
    %c12 = arith.constant 12 : index
    %c0_15 = arith.constant 0 : index
    %14 = vector.load %arg7[%c12, %c0_15] : memref<28x768xf32, #tpu.memory_space<vmem>>, vector<4x768xf32>
    tpu.vector_store %arg7[%c12, %c0_15], %13 {strides = array<i32>} : memref<28x768xf32, #tpu.memory_space<vmem>>, vector<4x768xf32>,
    %15 = vector.extract_strided_slice %6 {offsets = [0, 129], sizes = [4, 768], strides = [1, 1]} : vector<4x1024xf32> to vector<4x768xf32>
    %c16 = arith.constant 16 : index
    %c0_16 = arith.constant 0 : index
    %16 = vector.load %arg7[%c16, %c0_16] : memref<28x768xf32, #tpu.memory_space<vmem>>, vector<4x768xf32>
    tpu.vector_store %arg7[%c16, %c0_16], %15 {strides = array<i32>} : memref<28x768xf32, #tpu.memory_space<vmem>>, vector<4x768xf32>,
    %17 = vector.extract_strided_slice %6 {offsets = [0, 130], sizes = [4, 768], strides = [1, 1]} : vector<4x1024xf32> to vector<4x768xf32>
    %c20 = arith.constant 20 : index
    %c0_17 = arith.constant 0 : index
    %18 = vector.load %arg7[%c20, %c0_17] : memref<28x768xf32, #tpu.memory_space<vmem>>, vector<4x768xf32>
    tpu.vector_store %arg7[%c20, %c0_17], %17 {strides = array<i32>} : memref<28x768xf32, #tpu.memory_space<vmem>>, vector<4x768xf32>,
    %19 = vector.extract_strided_slice %6 {offsets = [0, 131], sizes = [4, 768], strides = [1, 1]} : vector<4x1024xf32> to vector<4x768xf32>
    %c24 = arith.constant 24 : index
    %c0_18 = arith.constant 0 : index
    %20 = vector.load %arg7[%c24, %c0_18] : memref<28x768xf32, #tpu.memory_space<vmem>>, vector<4x768xf32>
    tpu.vector_store %arg7[%c24, %c0_18], %19 {strides = array<i32>} : memref<28x768xf32, #tpu.memory_space<vmem>>, vector<4x768xf32>,
    %c0_19 = arith.constant 0 : index
    %c0_20 = arith.constant 0 : index
    %21 = vector.load %arg7[%c0_19, %c0_20] : memref<28x768xf32, #tpu.memory_space<vmem>>, vector<28x768xf32>
    %cst = arith.constant dense<0.000000e+00> : vector<15x768xf32>
    %22 = tpu.matmul %4, %21, %cst {dimension_numbers = #tpu.dot_dimension_numbers<[1], [0], [0], [1], [0, 0, 1, 1], [], []>} : vector<15x28xf32>, vector<28x768xf32>, vector<15x768xf32> -> vector<15x768xf32>
    %23 = vector.extract_strided_slice %22 {offsets = [0, 128], sizes = [4, 512], strides = [1, 1]} : vector<15x768xf32> to vector<4x512xf32>
    %24 = vector.broadcast %1 : vector<4x1xf32> to vector<4x512xf32>
    %25 = arith.addf %23, %24 : vector<4x512xf32>
    %26 = vector.broadcast %0 : vector<1x512xf32> to vector<4x512xf32>
    %27 = arith.mulf %25, %26 : vector<4x512xf32>
    %28 = vector.extract_strided_slice %22 {offsets = [4, 128], sizes = [4, 512], strides = [1, 1]} : vector<15x768xf32> to vector<4x512xf32>
    %29 = vector.broadcast %2 : vector<4x1xf32> to vector<4x512xf32>
    %30 = arith.addf %28, %29 : vector<4x512xf32>
    %cst_21 = arith.constant dense<0.000000e+00> : vector<4x4xf32>
    %31 = tpu.matmul %27, %27, %cst_21 {dimension_numbers = #tpu.dot_dimension_numbers<[1], [1], [0], [0], [0, 0, 1, 0], [], []>} : vector<4x512xf32>, vector<4x512xf32>, vector<4x4xf32> -> vector<4x4xf32>
    %cst_22 = arith.constant dense<0xFF800000> : vector<4xf32>
    %32 = vector.multi_reduction <maximumf>, %31, %cst_22 [1] : vector<4x4xf32> to vector<4xf32>
    %33 = vector.shape_cast %32 : vector<4xf32> to vector<4x1xf32>
    %34 = vector.broadcast %33 : vector<4x1xf32> to vector<4x4xf32>
    %35 = arith.subf %31, %34 : vector<4x4xf32>
    %36 = math.exp %35 : vector<4x4xf32>
    %cst_23 = arith.constant dense<0.000000e+00> : vector<4xf32>
    %37 = vector.multi_reduction <add>, %36, %cst_23 [1] : vector<4x4xf32> to vector<4xf32>
    %38 = vector.shape_cast %37 : vector<4xf32> to vector<4x1xf32>
    %39 = tpu.reciprocal %38 {approx = true} : vector<4x1xf32> -> vector<4x1xf32>
    %40 = vector.broadcast %39 : vector<4x1xf32> to vector<4x4xf32>
    %41 = arith.mulf %36, %40 : vector<4x4xf32>
    %cst_24 = arith.constant dense<0.000000e+00> : vector<4x512xf32>
    %42 = tpu.matmul %41, %27, %cst_24 {dimension_numbers = #tpu.dot_dimension_numbers<[1], [0], [0], [1], [0, 0, 1, 1], [], []>} : vector<4x4xf32>, vector<4x512xf32>, vector<4x512xf32> -> vector<4x512xf32>
    %43 = vector.extract_strided_slice %22 {offsets = [8, 62], sizes = [1, 512], strides = [1, 1]} : vector<15x768xf32> to vector<1x512xf32>
    %44 = vector.extract_strided_slice %22 {offsets = [9, 84], sizes = [1, 512], strides = [1, 1]} : vector<15x768xf32> to vector<1x512xf32>
    %45 = vector.extract_strided_slice %22 {offsets = [10, 106], sizes = [1, 512], strides = [1, 1]} : vector<15x768xf32> to vector<1x512xf32>
    %46 = vector.extract_strided_slice %22 {offsets = [11, 128], sizes = [1, 512], strides = [1, 1]} : vector<15x768xf32> to vector<1x512xf32>
    %47 = vector.extract_strided_slice %22 {offsets = [12, 150], sizes = [1, 512], strides = [1, 1]} : vector<15x768xf32> to vector<1x512xf32>
    %48 = vector.extract_strided_slice %22 {offsets = [13, 172], sizes = [1, 512], strides = [1, 1]} : vector<15x768xf32> to vector<1x512xf32>
    %49 = vector.extract_strided_slice %22 {offsets = [14, 194], sizes = [1, 512], strides = [1, 1]} : vector<15x768xf32> to vector<1x512xf32>
    %50 = arith.addf %43, %44 : vector<1x512xf32>
    %51 = arith.addf %45, %46 : vector<1x512xf32>
    %52 = arith.addf %50, %51 : vector<1x512xf32>
    %53 = arith.addf %47, %48 : vector<1x512xf32>
    %54 = arith.addf %53, %49 : vector<1x512xf32>
    %55 = arith.addf %52, %54 : vector<1x512xf32>
    %56 = vector.broadcast %3 : f32 to vector<1x512xf32>
    %57 = arith.addf %55, %56 : vector<1x512xf32>
    %58 = arith.negf %57 : vector<1x512xf32>
    %59 = math.exp %58 : vector<1x512xf32>
    %cst_25 = arith.constant 1.000000e+00 : f32
    %60 = vector.broadcast %cst_25 : f32 to vector<1x512xf32>
    %61 = arith.addf %60, %59 : vector<1x512xf32>
    %62 = arith.divf %60, %61 : vector<1x512xf32>
    %63 = vector.broadcast %62 : vector<1x512xf32> to vector<4x512xf32>
    %64 = arith.mulf %42, %63 : vector<4x512xf32>
    %65 = arith.addf %64, %30 : vector<4x512xf32>
    %c0_26 = arith.constant 0 : index
    %c0_27 = arith.constant 0 : index
    %c0_28 = arith.constant 0 : index
    %66 = vector.load %arg6[%c0_26, %c0_27, %c0_28] : memref<2x4x512xf32, #tpu.memory_space<vmem>>, vector<1x4x512xf32>
    %67 = vector.shape_cast %66 : vector<1x4x512xf32> to vector<4x512xf32>
    %68 = vector.shape_cast %65 : vector<4x512xf32> to vector<1x4x512xf32>
    tpu.vector_store %arg6[%c0_26, %c0_27, %c0_28], %68 {strides = array<i32>} : memref<2x4x512xf32, #tpu.memory_space<vmem>>, vector<1x4x512xf32>,
    %c1 = arith.constant 1 : index
    %c0_29 = arith.constant 0 : index
    %c0_30 = arith.constant 0 : index
    %69 = vector.load %arg1[%c1, %c0_29, %c0_30] : memref<2x4x1024xf32, #tpu.memory_space<vmem>>, vector<1x4x1024xf32>
    %70 = vector.shape_cast %69 : vector<1x4x1024xf32> to vector<4x1024xf32>
    %71 = vector.extract_strided_slice %70 {offsets = [0, 125], sizes = [4, 768], strides = [1, 1]} : vector<4x1024xf32> to vector<4x768xf32>
    %c0_31 = arith.constant 0 : index
    %c0_32 = arith.constant 0 : index
    %72 = vector.load %arg7[%c0_31, %c0_32] : memref<28x768xf32, #tpu.memory_space<vmem>>, vector<4x768xf32>
    tpu.vector_store %arg7[%c0_31, %c0_32], %71 {strides = array<i32>} : memref<28x768xf32, #tpu.memory_space<vmem>>, vector<4x768xf32>,
    %73 = vector.extract_strided_slice %70 {offsets = [0, 126], sizes = [4, 768], strides = [1, 1]} : vector<4x1024xf32> to vector<4x768xf32>
    %c4_33 = arith.constant 4 : index
    %c0_34 = arith.constant 0 : index
    %74 = vector.load %arg7[%c4_33, %c0_34] : memref<28x768xf32, #tpu.memory_space<vmem>>, vector<4x768xf32>
    tpu.vector_store %arg7[%c4_33, %c0_34], %73 {strides = array<i32>} : memref<28x768xf32, #tpu.memory_space<vmem>>, vector<4x768xf32>,
    %75 = vector.extract_strided_slice %70 {offsets = [0, 127], sizes = [4, 768], strides = [1, 1]} : vector<4x1024xf32> to vector<4x768xf32>
    %c8_35 = arith.constant 8 : index
    %c0_36 = arith.constant 0 : index
    %76 = vector.load %arg7[%c8_35, %c0_36] : memref<28x768xf32, #tpu.memory_space<vmem>>, vector<4x768xf32>
    tpu.vector_store %arg7[%c8_35, %c0_36], %75 {strides = array<i32>} : memref<28x768xf32, #tpu.memory_space<vmem>>, vector<4x768xf32>,
    %77 = vector.extract_strided_slice %70 {offsets = [0, 128], sizes = [4, 768], strides = [1, 1]} : vector<4x1024xf32> to vector<4x768xf32>
    %c12_37 = arith.constant 12 : index
    %c0_38 = arith.constant 0 : index
    %78 = vector.load %arg7[%c12_37, %c0_38] : memref<28x768xf32, #tpu.memory_space<vmem>>, vector<4x768xf32>
    tpu.vector_store %arg7[%c12_37, %c0_38], %77 {strides = array<i32>} : memref<28x768xf32, #tpu.memory_space<vmem>>, vector<4x768xf32>,
    %79 = vector.extract_strided_slice %70 {offsets = [0, 129], sizes = [4, 768], strides = [1, 1]} : vector<4x1024xf32> to vector<4x768xf32>
    %c16_39 = arith.constant 16 : index
    %c0_40 = arith.constant 0 : index
    %80 = vector.load %arg7[%c16_39, %c0_40] : memref<28x768xf32, #tpu.memory_space<vmem>>, vector<4x768xf32>
    tpu.vector_store %arg7[%c16_39, %c0_40], %79 {strides = array<i32>} : memref<28x768xf32, #tpu.memory_space<vmem>>, vector<4x768xf32>,
    %81 = vector.extract_strided_slice %70 {offsets = [0, 130], sizes = [4, 768], strides = [1, 1]} : vector<4x1024xf32> to vector<4x768xf32>
    %c20_41 = arith.constant 20 : index
    %c0_42 = arith.constant 0 : index
    %82 = vector.load %arg7[%c20_41, %c0_42] : memref<28x768xf32, #tpu.memory_space<vmem>>, vector<4x768xf32>
    tpu.vector_store %arg7[%c20_41, %c0_42], %81 {strides = array<i32>} : memref<28x768xf32, #tpu.memory_space<vmem>>, vector<4x768xf32>,
    %83 = vector.extract_strided_slice %70 {offsets = [0, 131], sizes = [4, 768], strides = [1, 1]} : vector<4x1024xf32> to vector<4x768xf32>
    %c24_43 = arith.constant 24 : index
    %c0_44 = arith.constant 0 : index
    %84 = vector.load %arg7[%c24_43, %c0_44] : memref<28x768xf32, #tpu.memory_space<vmem>>, vector<4x768xf32>
    tpu.vector_store %arg7[%c24_43, %c0_44], %83 {strides = array<i32>} : memref<28x768xf32, #tpu.memory_space<vmem>>, vector<4x768xf32>,
    %c0_45 = arith.constant 0 : index
    %c0_46 = arith.constant 0 : index
    %85 = vector.load %arg7[%c0_45, %c0_46] : memref<28x768xf32, #tpu.memory_space<vmem>>, vector<28x768xf32>
    %cst_47 = arith.constant dense<0.000000e+00> : vector<15x768xf32>
    %86 = tpu.matmul %4, %85, %cst_47 {dimension_numbers = #tpu.dot_dimension_numbers<[1], [0], [0], [1], [0, 0, 1, 1], [], []>} : vector<15x28xf32>, vector<28x768xf32>, vector<15x768xf32> -> vector<15x768xf32>
    %87 = vector.extract_strided_slice %86 {offsets = [0, 128], sizes = [4, 512], strides = [1, 1]} : vector<15x768xf32> to vector<4x512xf32>
    %88 = vector.broadcast %1 : vector<4x1xf32> to vector<4x512xf32>
    %89 = arith.addf %87, %88 : vector<4x512xf32>
    %90 = vector.broadcast %0 : vector<1x512xf32> to vector<4x512xf32>
    %91 = arith.mulf %89, %90 : vector<4x512xf32>
    %92 = vector.extract_strided_slice %86 {offsets = [4, 128], sizes = [4, 512], strides = [1, 1]} : vector<15x768xf32> to vector<4x512xf32>
    %93 = vector.broadcast %2 : vector<4x1xf32> to vector<4x512xf32>
    %94 = arith.addf %92, %93 : vector<4x512xf32>
    %cst_48 = arith.constant dense<0.000000e+00> : vector<4x4xf32>
    %95 = tpu.matmul %91, %91, %cst_48 {dimension_numbers = #tpu.dot_dimension_numbers<[1], [1], [0], [0], [0, 0, 1, 0], [], []>} : vector<4x512xf32>, vector<4x512xf32>, vector<4x4xf32> -> vector<4x4xf32>
    %cst_49 = arith.constant dense<0xFF800000> : vector<4xf32>
    %96 = vector.multi_reduction <maximumf>, %95, %cst_49 [1] : vector<4x4xf32> to vector<4xf32>
    %97 = vector.shape_cast %96 : vector<4xf32> to vector<4x1xf32>
    %98 = vector.broadcast %97 : vector<4x1xf32> to vector<4x4xf32>
    %99 = arith.subf %95, %98 : vector<4x4xf32>
    %100 = math.exp %99 : vector<4x4xf32>
    %cst_50 = arith.constant dense<0.000000e+00> : vector<4xf32>
    %101 = vector.multi_reduction <add>, %100, %cst_50 [1] : vector<4x4xf32> to vector<4xf32>
    %102 = vector.shape_cast %101 : vector<4xf32> to vector<4x1xf32>
    %103 = tpu.reciprocal %102 {approx = true} : vector<4x1xf32> -> vector<4x1xf32>
    %104 = vector.broadcast %103 : vector<4x1xf32> to vector<4x4xf32>
    %105 = arith.mulf %100, %104 : vector<4x4xf32>
    %cst_51 = arith.constant dense<0.000000e+00> : vector<4x512xf32>
    %106 = tpu.matmul %105, %91, %cst_51 {dimension_numbers = #tpu.dot_dimension_numbers<[1], [0], [0], [1], [0, 0, 1, 1], [], []>} : vector<4x4xf32>, vector<4x512xf32>, vector<4x512xf32> -> vector<4x512xf32>
    %107 = vector.extract_strided_slice %86 {offsets = [8, 62], sizes = [1, 512], strides = [1, 1]} : vector<15x768xf32> to vector<1x512xf32>
    %108 = vector.extract_strided_slice %86 {offsets = [9, 84], sizes = [1, 512], strides = [1, 1]} : vector<15x768xf32> to vector<1x512xf32>
    %109 = vector.extract_strided_slice %86 {offsets = [10, 106], sizes = [1, 512], strides = [1, 1]} : vector<15x768xf32> to vector<1x512xf32>
    %110 = vector.extract_strided_slice %86 {offsets = [11, 128], sizes = [1, 512], strides = [1, 1]} : vector<15x768xf32> to vector<1x512xf32>
    %111 = vector.extract_strided_slice %86 {offsets = [12, 150], sizes = [1, 512], strides = [1, 1]} : vector<15x768xf32> to vector<1x512xf32>
    %112 = vector.extract_strided_slice %86 {offsets = [13, 172], sizes = [1, 512], strides = [1, 1]} : vector<15x768xf32> to vector<1x512xf32>
    %113 = vector.extract_strided_slice %86 {offsets = [14, 194], sizes = [1, 512], strides = [1, 1]} : vector<15x768xf32> to vector<1x512xf32>
    %114 = arith.addf %107, %108 : vector<1x512xf32>
    %115 = arith.addf %109, %110 : vector<1x512xf32>
    %116 = arith.addf %114, %115 : vector<1x512xf32>
    %117 = arith.addf %111, %112 : vector<1x512xf32>
    %118 = arith.addf %117, %113 : vector<1x512xf32>
    %119 = arith.addf %116, %118 : vector<1x512xf32>
    %120 = vector.broadcast %3 : f32 to vector<1x512xf32>
    %121 = arith.addf %119, %120 : vector<1x512xf32>
    %122 = arith.negf %121 : vector<1x512xf32>
    %123 = math.exp %122 : vector<1x512xf32>
    %cst_52 = arith.constant 1.000000e+00 : f32
    %124 = vector.broadcast %cst_52 : f32 to vector<1x512xf32>
    %125 = arith.addf %124, %123 : vector<1x512xf32>
    %126 = arith.divf %124, %125 : vector<1x512xf32>
    %127 = vector.broadcast %126 : vector<1x512xf32> to vector<4x512xf32>
    %128 = arith.mulf %106, %127 : vector<4x512xf32>
    %129 = arith.addf %128, %94 : vector<4x512xf32>
    %c1_53 = arith.constant 1 : index
    %c0_54 = arith.constant 0 : index
    %c0_55 = arith.constant 0 : index
    %130 = vector.load %arg6[%c1_53, %c0_54, %c0_55] : memref<2x4x512xf32, #tpu.memory_space<vmem>>, vector<1x4x512xf32>
    %131 = vector.shape_cast %130 : vector<1x4x512xf32> to vector<4x512xf32>
    %132 = vector.shape_cast %129 : vector<4x512xf32> to vector<1x4x512xf32>
    tpu.vector_store %arg6[%c1_53, %c0_54, %c0_55], %132 {strides = array<i32>} : memref<2x4x512xf32, #tpu.memory_space<vmem>>, vector<1x4x512xf32>,
    return
  }
  func.func @transform_0(%arg0: i32) -> (i32, i32, i32) {
    %c0_i32 = arith.constant 0 : i32
    %c0_i32_0 = arith.constant 0 : i32
    %c0_i32_1 = arith.constant 0 : i32
    return %arg0, %c0_i32, %c0_i32_0 : i32, i32, i32
  }
  func.func @transform_1(%arg0: i32) -> (i32, i32) {
    %c0_i32 = arith.constant 0 : i32
    %c0_i32_0 = arith.constant 0 : i32
    %c0_i32_1 = arith.constant 0 : i32
    return %c0_i32, %c0_i32_0 : i32, i32
  }
  func.func @transform_2(%arg0: i32) -> (i32, i32) {
    %c0_i32 = arith.constant 0 : i32
    %c0_i32_0 = arith.constant 0 : i32
    %c0_i32_1 = arith.constant 0 : i32
    return %c0_i32, %c0_i32_0 : i32, i32
  }
  func.func @transform_3(%arg0: i32) -> (i32, i32) {
    %c0_i32 = arith.constant 0 : i32
    %c0_i32_0 = arith.constant 0 : i32
    %c0_i32_1 = arith.constant 0 : i32
    return %c0_i32, %c0_i32_0 : i32, i32
  }
  func.func @transform_4(%arg0: i32) -> i32 {
    %c0_i32 = arith.constant 0 : i32
    %c0_i32_0 = arith.constant 0 : i32
    return %c0_i32 : i32
  }
  func.func @transform_5(%arg0: i32) -> (i32, i32, i32) {
    %c0_i32 = arith.constant 0 : i32
    %c0_i32_0 = arith.constant 0 : i32
    %c0_i32_1 = arith.constant 0 : i32
    return %arg0, %c0_i32, %c0_i32_0 : i32, i32, i32
  }
}

</mosaic_0001>

<bundles_post_ra>
// kernel: spin_forward.1
= control target key start
LH: loop header
LB: loop body
LE: loop exit
PB: predicated region body
PF: predicated region fallthrough
CT: control target
= control target key end

     0   :  { %s2331_s24 = smov 127   ;;  %s2332_s25 = smov 125   ;;  %v2337_v12 = vmov 0.0   ;;  %v2338_v13 = vmov 0   ;;  %vm231_vm0 = vcmask 1022976   ;;  %vm165_vm1 = vcmask 1039360   ;;  %s3112_s0 = inlined_call_operand.vmem [shape: f32[2,4,1024], index: 0, kind: input, shape index: {}]   ;;  %s3113_s3 = inlined_call_operand.vmem [shape: f32[8,1], index: 3, kind: input, shape index: {}]   ;;  %s3114_s2 = inlined_call_operand.vmem [shape: f32[15,28], index: 2, kind: input, shape index: {}]   ;;  %s3115_s1 = inlined_call_operand.vmem [shape: f32[1,512], index: 1, kind: input, shape index: {}]   ;;  %s3116_s4 = inlined_call_operand.<no memory space> [shape: f32[1], index: 4, kind: input, shape index: {}]   ;;  %s3117_s5 = inlined_call_operand.vmem [shape: f32[2,4,512], index: 5, kind: output, shape index: {}]  }
   0x1   :  { %v28_v0 = vld [vmem:[%s3112_s0 + $0x8] sm:$0xff]  ;;  %v27_v1 = vld [vmem:[%s3112_s0] sm:$0xff]  ;;  %v2382_v2 = vld [vmem:[%s3112_s0 + $0x10] sm:$0xff]  ;;  %s2333_s28 = smov 126   ;;  %s2334_s29 = smov 1   ;;  %364 = vmatprep.mubr.f32.mxu0 %v2337_v12  ;;  %440 = vmatprep.mubr.f32.mxu1 %v2337_v12  ;;  %vm198_vm2 = vcmask 1031168  }
   0x2   :  { %153 = vrot.lane.b32.xlu1 %v28_v0, %s2331_s24  ;;  %146 = vst [vmem:[#allocation2 + $0x88] sm:$0xf0] %v28_v0  ;;  %219 = vrot.lane.b32.xlu0 %v28_v0, %s2332_s25  ;;  %v36_v3 = vcombine.high %v28_v0, %v28_v0  ;;  %v35_v4 = vcombine.high %v27_v1, %v27_v1  ;;  %144 = vst [vmem:[#allocation2 + $0x40] sm:$0xf0] %v27_v1  ;;  %v30_v7 = vld [vmem:[%s3112_s0 + $0x18] sm:$0xff]  ;;  %s2335_s30 = smov 3  }
   0x3   :  { %v72_v5 = vcombine.low %v28_v0, %v28_v0  ;;  %148 = vst [vmem:[#allocation2 + $0x18] sm:$0xf0] %v2382_v2  ;;  %v73_v6 = vcombine.low %v2382_v2, %v2382_v2  ;;  %v74_v8 = vcombine.low %v30_v7, %v30_v7  ;;  %v37_v9 = vcombine.high %v2382_v2, %v2382_v2  ;;  %s2336_s6 = smov 2   ;;  %v22_v14 = vld [vmem:[%s3113_s3] sm:$0xf]  ;;  %v2469_v43 = vld [vmem:[%s3112_s0 + $0x28] sm:$0xff] }
   0x4   :  { %v71_v10 = vcombine.low %v27_v1, %v27_v1  ;;  %v150_v11 = vcombine.high %v30_v7, %v30_v7  ;;  %2266 = vset.pattern.permute.xlu0 %v2338_v13  ;;  %vm281_vm3 = vcmask 1043456   ;;  %vm122_vm4 = vcmask 7168   ;;  %v2487_v53 = vld [vmem:[%s3112_s0 + $0x20] sm:$0xff]  ;;  %s2340_s21 = smov 84   ;;  %s2341_s22 = smov 40  }
   0x5   :  { %145 = vst [vmem:[#allocation2 + $0x78] sm:$0xf0] %v72_v5  ;;  %147 = vst [vmem:[#allocation2 + $0x90] sm:$0xf0] %v73_v6  ;;  %vm52_vm5 = vcmask 23552   ;;  %v2475_v46 = vcombine.low %v2469_v43, %v2469_v43  ;;  %vm89_vm6 = vcmask 15360  }
   0x6   :  { %221 = vrot.lane.b32.xlu0 %v36_v3, %s2332_s25  ;;  %217 = vrot.lane.b32.xlu1 %v35_v4, %s2332_s25  ;;  %149 = vst [vmem:[#allocation2 + $0x98] sm:$0xf0] %v74_v8  ;;  %vm274_vm7 = vcmask 228352   ;;  %vm713_vm8 = vcmask 27648   ;;  %vm725_vm9 = vcmask 31744   ;;  %vm903_vm10 = vcmask 867328  }
   0x7   :  { %vm940_vm11 = vcmask 687104   ;;  %vm1013_vm12 = vcmask 326656   ;;  %vm1099_vm13 = vcmask 539648  }
   0xa   :  { %155 = vrot.lane.b32.xlu0 %v36_v3, %s2331_s24  ;;  %186 = vrot.lane.b32.xlu1 %v72_v5, %s2333_s28 }
   0xe   :  { %188 = vrot.lane.b32.xlu0 %v28_v0, %s2333_s28  ;;  %151 = vrot.lane.b32.xlu1 %v35_v4, %s2331_s24 }
  0x12   :  { %184 = vrot.lane.b32.xlu0 %v27_v1, %s2333_s28  ;;  %110 = vrot.lane.b32.xlu1 %v35_v4, %s2334_s29 }
  0x16   :  { %112 = vrot.lane.b32.xlu0 %v28_v0, %s2334_s29  ;;  %223 = vrot.lane.b32.xlu1 %v2382_v2, %s2332_s25 }
  0x1a   :  { %225 = vrot.lane.b32.xlu0 %v37_v9, %s2332_s25  ;;  %108 = vrot.lane.b32.xlu1 %v27_v1, %s2334_s29 }
  0x1e   :  { %40 = vrot.lane.b32.xlu0 %v35_v4, %s2335_s30  ;;  %42 = vrot.lane.b32.xlu1 %v28_v0, %s2335_s30 }
  0x22   :  { %77 = vrot.lane.b32.xlu0 %v27_v1, %s2336_s6  ;;  %79 = vrot.lane.b32.xlu1 %v72_v5, %s2336_s6 }
  0x26   :  { %157 = vrot.lane.b32.xlu0 %v2382_v2, %s2331_s24  ;;  %159 = vrot.lane.b32.xlu1 %v37_v9, %s2331_s24 }
  0x2a   :  { %190 = vrot.lane.b32.xlu0 %v73_v6, %s2333_s28  ;;  %192 = vrot.lane.b32.xlu1 %v2382_v2, %s2333_s28 }
  0x2e   :  { %38 = vrot.lane.b32.xlu0 %v27_v1, %s2335_s30  ;;  %75 = vrot.lane.b32.xlu1 %v71_v10, %s2336_s6 }
  0x32   :  { %114 = vrot.lane.b32.xlu0 %v36_v3, %s2334_s29  ;;  %116 = vrot.lane.b32.xlu1 %v2382_v2, %s2334_s29 }
  0x36   :  { %227 = vrot.lane.b32.xlu0 %v30_v7, %s2332_s25  ;;  %229 = vrot.lane.b32.xlu1 %v150_v11, %s2332_s25 }
  0x3a   :  { %44 = vrot.lane.b32.xlu0 %v36_v3, %s2335_s30  ;;  %46 = vrot.lane.b32.xlu1 %v2382_v2, %s2335_s30 }
  0x3e   :  { %81 = vrot.lane.b32.xlu0 %v28_v0, %s2336_s6  ;;  %83 = vrot.lane.b32.xlu1 %v73_v6, %s2336_s6 }
  0x42   :  { %161 = vrot.lane.b32.xlu0 %v30_v7, %s2331_s24  ;;  %163 = vrot.lane.b32.xlu1 %v150_v11, %s2331_s24 }
  0x46   :  { %194 = vrot.lane.b32.xlu0 %v74_v8, %s2333_s28  ;;  %196 = vrot.lane.b32.xlu1 %v30_v7, %s2333_s28 }
  0x4a   :  { %118 = vrot.lane.b32.xlu0 %v37_v9, %s2334_s29  ;;  %120 = vrot.lane.b32.xlu1 %v30_v7, %s2334_s29 }
  0x4e   :  { %48 = vrot.lane.b32.xlu0 %v37_v9, %s2335_s30  ;;  %50 = vrot.lane.b32.xlu1 %v30_v7, %s2335_s30 }
  0x52   :  { %85 = vrot.lane.b32.xlu0 %v2382_v2, %s2336_s6  ;;  %87 = vrot.lane.b32.xlu1 %v74_v8, %s2336_s6 }
  0x56   :  { %531 = vperm.xlu0 %2266, %v22_v14   ;;  %v2514_v14 = vld [vmem:[%s3114_s2] sm:$0xff] }
  0x74   :  { %v154_v15 = vpop.permute.xlu1 %153  ;;  %v220_v16 = vpop.permute.xlu0 %219 }
  0x78   :  { %v222_v17 = vpop.permute.xlu0 %221  ;;  %v218_v18 = vpop.permute.xlu1 %217 }
  0x79   :  { %v233_v19 = vsel %vm231_vm0, %v220_v16, %v222_v17  ;;  %v232_v20 = vsel %vm231_vm0, %v218_v18, %v220_v16  ;;  %v2522_v18 = vld [vmem:[%s3112_s0 + $0x30] sm:$0xff] }
  0x7a   :  { %245 = vst [vmem:[#allocation2 + $0x58] sm:$0xf] %v233_v19  ;;  %244 = vst [vmem:[#allocation2 + $0x30] sm:$0xf] %v232_v20 }
  0x7c   :  { %v2447_v21 = vpop.permute.xlu0 %155  ;;  %v187_v22 = vpop.permute.xlu1 %186 }
  0x7d   :  { %v167_v23 = vsel %vm165_vm1, %v154_v15, %v2447_v21 }
  0x7e   :  { %179 = vst [vmem:[#allocation2 + $0x50] sm:$0xf] %v167_v23 }
  0x80   :  { %v2451_v24 = vpop.permute.xlu0 %188  ;;  %v152_v25 = vpop.permute.xlu1 %151 }
  0x81   :  { %v200_v26 = vsel %vm198_vm2, %v187_v22, %v2451_v24  ;;  %v166_v27 = vsel %vm165_vm1, %v152_v25, %v154_v15  ;;  %v269_v28 = vld [vmem:[#allocation2 + $0x58] sm:$0xf]  ;;  %v268_v29 = vld [vmem:[#allocation2 + $0x30] sm:$0xf] }
  0x82   :  { %212 = vst [vmem:[#allocation2 + $0x50] sm:$0xf0] %v200_v26  ;;  %178 = vst [vmem:[#allocation2 + $0x38] sm:$0xf] %v166_v27  ;;  %2202 = vmatprep.subr.msk.mxu0 %vm281_vm3, %v269_v28 }
  0x83   :  { %2203 = vmatpush1.msk.msra.mxu0 %vm281_vm3, %v268_v29 }
  0x84   :  { %v185_v30 = vpop.permute.xlu0 %184  ;;  %v111_v31 = vpop.permute.xlu1 %110 }
  0x85   :  { %v199_v32 = vsel %vm198_vm2, %v185_v30, %v187_v22  ;;  %v2534_v22 = vld [vmem:[%s3114_s2 + $0x8] sm:$0x7f] }
  0x86   :  { %211 = vst [vmem:[#allocation2 + $0x38] sm:$0xf0] %v199_v32 }
  0x88   :  { %v113_v33 = vpop.permute.xlu0 %112  ;;  %v224_v34 = vpop.permute.xlu1 %223 }
  0x89   :  { %v124_v35 = vsel %vm122_vm4, %v111_v31, %v113_v33  ;;  %v234_v36 = vsel %vm231_vm0, %v222_v17, %v224_v34  ;;  %v263_v37 = vld [vmem:[#allocation2 + $0x50] sm:$0xff] }
  0x8a   :  { %136 = vst [vmem:[#allocation2 + $0x78] sm:$0xf] %v124_v35  ;;  %246 = vst [vmem:[#allocation2 + $0x80] sm:$0xf] %v234_v36  ;;  %326 = vmatprep.subr.mxu0 %v263_v37 }
  0x8c   :  { %v2461_v38 = vpop.permute.xlu0 %225  ;;  %v109_v39 = vpop.permute.xlu1 %108 }
  0x8d   :  { %v235_v40 = vsel %vm231_vm0, %v224_v34, %v2461_v38  ;;  %v123_v41 = vsel %vm122_vm4, %v109_v39, %v111_v31  ;;  %v262_v42 = vld [vmem:[#allocation2 + $0x38] sm:$0xff] }
  0x8e   :  { %247 = vst [vmem:[#allocation2 + $0xb8] sm:$0xf] %v235_v40  ;;  %135 = vst [vmem:[#allocation2 + $0x40] sm:$0xf] %v123_v41  ;;  %327 = vmatpush1.msra.mxu0 %v262_v42 }
  0x90   :  { %v41_v44 = vpop.permute.xlu0 %40  ;;  %v2471_v45 = vpop.permute.xlu1 %42 }
  0x91   :  { %v54_v47 = vsel %vm52_vm5, %v41_v44, %v2471_v45  ;;  %v257_v48 = vld [vmem:[#allocation2 + $0x78] sm:$0xff]  ;;  %v270_v55 = vld [vmem:[#allocation2 + $0x80] sm:$0xf] }
  0x92   :  { %66 = vst [vmem:[#allocation2] sm:$0xf] %v54_v47  ;;  %328 = vmatprep.subr.mxu0 %v257_v48  ;;  %1254 = vst [vmem:[#allocation2 + $0x78] sm:$0xf0] %v2475_v46 }
  0x94   :  { %v78_v49 = vpop.permute.xlu0 %77  ;;  %v2480_v50 = vpop.permute.xlu1 %79 }
  0x95   :  { %v91_v51 = vsel %vm89_vm6, %v78_v49, %v2480_v50  ;;  %v256_v52 = vld [vmem:[#allocation2 + $0x40] sm:$0xff]  ;;  %v271_v54 = vld [vmem:[#allocation2 + $0xb8] sm:$0xf] }
  0x96   :  { %103 = vst [vmem:[#allocation2] sm:$0xf0] %v91_v51  ;;  %329 = vmatpush1.msra.mxu0 %v256_v52  ;;  %1253 = vst [vmem:[#allocation2 + $0x40] sm:$0xf0] %v2487_v53  ;;  %2206 = vmatprep.subr.msk.mxu1 %vm281_vm3, %v271_v54 }
  0x97   :  { %2207 = vmatpush1.msk.msra.mxu1 %vm281_vm3, %v270_v55 }
  0x98   :  { %v158_v56 = vpop.permute.xlu0 %157  ;;  %v2492_v57 = vpop.permute.xlu1 %159 }
  0x99   :  { %v168_v58 = vsel %vm165_vm1, %v2447_v21, %v158_v56  ;;  %v169_v59 = vsel %vm165_vm1, %v158_v56, %v2492_v57  ;;  %v2528_v21 = vcombine.low %v2522_v18, %v2522_v18  ;;  %v2568_v56 = vld [vmem:[%s3112_s0 + $0x38] sm:$0xff] }
  0x9a   :  { %180 = vst [vmem:[#allocation2 + $0x70] sm:$0xf] %v168_v58  ;;  %181 = vst [vmem:[#allocation2 + $0xa0] sm:$0xf] %v169_v59  ;;  %v2572_v59 = vcombine.low %v2568_v56, %v2568_v56 }
  0x9c   :  { %v191_v60 = vpop.permute.xlu0 %190  ;;  %v2498_v61 = vpop.permute.xlu1 %192 }
  0x9d   :  { %v201_v62 = vsel %vm198_vm2, %v2451_v24, %v191_v60  ;;  %v202_v63 = vsel %vm198_vm2, %v191_v60, %v2498_v61  ;;  %v251_v0 = vld [vmem:[#allocation2] sm:$0xff] }
  0x9e   :  { %213 = vst [vmem:[#allocation2 + $0x70] sm:$0xf0] %v201_v62  ;;  %214 = vst [vmem:[#allocation2 + $0xa0] sm:$0xf0] %v202_v63  ;;  %330 = vmatprep.subr.mxu0 %v251_v0 }
  0xa0   :  { %v39_v1 = vpop.permute.xlu0 %38  ;;  %v76_v2 = vpop.permute.xlu1 %75 }
  0xa1   :  { %v53_v3 = vsel %vm52_vm5, %v39_v1, %v41_v44  ;;  %v90_v4 = vsel %vm89_vm6, %v76_v2, %v78_v49 }
  0xa2   :  { %65 = vst [vmem:[#allocation2 + $0xb0] sm:$0xf] %v53_v3  ;;  %102 = vst [vmem:[#allocation2 + $0xb0] sm:$0xf0] %v90_v4  ;;  %v539_v3 = vlaneseq }
  0xa4   :  { %v115_v5 = vpop.permute.xlu0 %114  ;;  %v2506_v6 = vpop.permute.xlu1 %116  ;;  %v540_v4 = vshrl.u32 %v539_v3, 7 }
  0xa5   :  { %v125_v7 = vsel %vm122_vm4, %v113_v33, %v115_v5  ;;  %v126_v8 = vsel %vm122_vm4, %v115_v5, %v2506_v6  ;;  %v265_v9 = vld [vmem:[#allocation2 + $0xa0] sm:$0xff]  ;;  %v264_v10 = vld [vmem:[#allocation2 + $0x70] sm:$0xff] }
  0xa6   :  { %137 = vst [vmem:[#allocation2 + $0x88] sm:$0xf] %v125_v7  ;;  %138 = vst [vmem:[#allocation2 + $0x90] sm:$0xf] %v126_v8  ;;  %402 = vmatprep.subr.mxu1 %v265_v9  ;;  %v2584_v5 = vsub.s32 0, %v540_v4  ;;  %v545_v8 = vsub.s32 1, %v540_v4 }
  0xa7   :  { %403 = vmatpush1.msra.mxu1 %v264_v10  ;;  %v21_v7 = vld [vmem:[%s3115_s1] sm:$0xf]  ;;  %s2339_s1 = smov 106  }
  0xa8   :  { %v228_v11 = vpop.permute.xlu0 %227  ;;  %v230_v13 = vpop.permute.xlu1 %229 }
  0xa9   :  { %v236_v15 = vsel %vm231_vm0, %v2461_v38, %v228_v11  ;;  %v237_v16 = vsel %vm231_vm0, %v228_v11, %v230_v13  ;;  %v250_v17 = vld [vmem:[#allocation2 + $0xb0] sm:$0xff]  ;;  %v2596_v11 = vrot.slane %v21_v7, %v2584_v5  ;;  %v2598_v13 = vrot.slane %v21_v7, %v545_v8 }
  0xaa   :  { %248 = vst [vmem:[#allocation2 + $0x20] sm:$0xf] %v236_v15  ;;  %249 = vst [vmem:[#allocation2 + $0x8] sm:$0xf] %v237_v16  ;;  %331 = vmatpush1.msra.mxu0 %v250_v17 }
  0xab   :  { %2204 = vmatmul.mubr.msk.f32.vlgmr.msra.gmra.mxu0 %vm274_vm7, %v2514_v14 }
  0xac   :  { %v45_v19 = vpop.permute.xlu0 %44  ;;  %v47_v20 = vpop.permute.xlu1 %46  ;;  %369 = vmatprep.mubr.f32.mxu0 %v2337_v12 }
  0xad   :  { %v55_v23 = vsel %vm52_vm5, %v2471_v45, %v45_v19  ;;  %v56_v24 = vsel %vm52_vm5, %v45_v19, %v47_v20  ;;  %v259_v25 = vld [vmem:[#allocation2 + $0x90] sm:$0xff]  ;;  %v258_v26 = vld [vmem:[#allocation2 + $0x88] sm:$0xff] }
  0xae   :  { %67 = vst [vmem:[#allocation2 + $0x10] sm:$0xf] %v55_v23  ;;  %68 = vst [vmem:[#allocation2 + $0x48] sm:$0xf] %v56_v24  ;;  %404 = vmatprep.subr.mxu1 %v259_v25  ;;  %v553_v23 = vsub.s32 3, %v540_v4  ;;  %v549_v24 = vsub.s32 2, %v540_v4  ;;  %v1259_v4 = vcombine.high %v2568_v56, %v2568_v56 }
  0xaf   :  { %1256 = vst [vmem:[#allocation2 + $0x90] sm:$0xf0] %v2528_v21  ;;  %1255 = vst [vmem:[#allocation2 + $0x88] sm:$0xf0] %v2469_v43  ;;  %405 = vmatpush1.msra.mxu1 %v258_v26  ;;  %2205 = vmatmul.mubr.msk.f32.gmra.mxu0 %vm274_vm7, %v2534_v22 }
  0xb0   :  { %v82_v27 = vpop.permute.xlu0 %81  ;;  %v84_v28 = vpop.permute.xlu1 %83  ;;  %517 = vmatprep.mubr.f32.mxu0 %v2337_v12 }
  0xb1   :  { %v92_v29 = vsel %vm89_vm6, %v2480_v50, %v82_v27  ;;  %v93_v30 = vsel %vm89_vm6, %v82_v27, %v84_v28  ;;  %v273_v31 = vld [vmem:[#allocation2 + $0x8] sm:$0xf]  ;;  %v272_v32 = vld [vmem:[#allocation2 + $0x20] sm:$0xf]  ;;  %v2614_v27 = vrot.slane %v21_v7, %v553_v23 }
  0xb2   :  { %104 = vst [vmem:[#allocation2 + $0x10] sm:$0xf0] %v92_v29  ;;  %105 = vst [vmem:[#allocation2 + $0x48] sm:$0xf0] %v93_v30  ;;  %2210 = vmatprep.subr.msk.mxu0 %vm281_vm3, %v273_v31  ;;  %v2618_v29 = vrot.slane %v21_v7, %v549_v24 }
  0xb3   :  { %2211 = vmatpush1.msk.msra.mxu0 %vm281_vm3, %v272_v32 }
  0xb4   :  { %v162_v33 = vpop.permute.xlu0 %161  ;;  %v164_v34 = vpop.permute.xlu1 %163 }
  0xb5   :  { %v170_v35 = vsel %vm165_vm1, %v2492_v57, %v162_v33  ;;  %v171_v36 = vsel %vm165_vm1, %v162_v33, %v164_v34 }
  0xb6   :  { %182 = vst [vmem:[#allocation2 + $0xa8] sm:$0xf] %v170_v35  ;;  %183 = vst [vmem:[#allocation2 + $0x68] sm:$0xf] %v171_v36  ;;  %v1148_v35 = vcombine.high %v2469_v43, %v2469_v43  ;;  %v2641_v36 = vcombine.high %v2522_v18, %v2522_v18 }
  0xb8   :  { %v195_v37 = vpop.permute.xlu0 %194  ;;  %v197_v38 = vpop.permute.xlu1 %196  ;;  %1328 = vrot.lane.b32.xlu0 %v1148_v35, %s2332_s25 }
  0xb9   :  { %v203_v39 = vsel %vm198_vm2, %v2498_v61, %v195_v37  ;;  %v204_v40 = vsel %vm198_vm2, %v195_v37, %v197_v38  ;;  %v253_v41 = vld [vmem:[#allocation2 + $0x48] sm:$0xff]  ;;  %v252_v42 = vld [vmem:[#allocation2 + $0x10] sm:$0xff]  ;;  %v1147_v37 = vcombine.high %v2487_v53, %v2487_v53 }
  0xba   :  { %215 = vst [vmem:[#allocation2 + $0xa8] sm:$0xf0] %v203_v39  ;;  %216 = vst [vmem:[#allocation2 + $0x68] sm:$0xf0] %v204_v40  ;;  %406 = vmatprep.subr.mxu1 %v253_v41 }
  0xbb   :  { %407 = vmatpush1.msra.mxu1 %v252_v42 }
  0xbc   :  { %v119_v44 = vpop.permute.xlu0 %118  ;;  %v121_v45 = vpop.permute.xlu1 %120  ;;  %2208 = vmatmul.mubr.msk.f32.vlgmr.msra.gmra.mxu1 %vm274_vm7, %v2514_v14  ;;  %1264 = vrot.lane.b32.xlu0 %v1148_v35, %s2331_s24 }
  0xbd   :  { %v127_v47 = vsel %vm122_vm4, %v2506_v6, %v119_v44  ;;  %v128_v48 = vsel %vm122_vm4, %v119_v44, %v121_v45  ;;  %446 = vmatprep.mubr.f32.mxu1 %v2337_v12 }
  0xbe   :  { %139 = vst [vmem:[#allocation2 + $0x18] sm:$0xf] %v127_v47  ;;  %140 = vst [vmem:[#allocation2 + $0x98] sm:$0xf] %v128_v48 }
  0xc0   :  { %v49_v49 = vpop.permute.xlu0 %48  ;;  %v51_v50 = vpop.permute.xlu1 %50  ;;  %2209 = vmatmul.mubr.msk.f32.gmra.mxu1 %vm274_vm7, %v2534_v22  ;;  %1296 = vrot.lane.b32.xlu0 %v2469_v43, %s2333_s28 }
  0xc1   :  { %v57_v51 = vsel %vm52_vm5, %v47_v20, %v49_v49  ;;  %v58_v52 = vsel %vm52_vm5, %v49_v49, %v51_v50  ;;  %v267_v54 = vld [vmem:[#allocation2 + $0x68] sm:$0xff] }
  0xc2   :  { %v266_v55 = vld [vmem:[#allocation2 + $0xa8] sm:$0xff]  ;;  %69 = vst [vmem:[#allocation2 + $0x60] sm:$0xf] %v57_v51  ;;  %70 = vst [vmem:[#allocation2 + $0x28] sm:$0xf] %v58_v52  ;;  %479 = vmatprep.subr.mxu0 %v267_v54 }
  0xc3   :  { %480 = vmatpush1.msra.mxu0 %v266_v55 }
  0xc4   :  { %v86_v57 = vpop.permute.xlu0 %85  ;;  %v88_v58 = vpop.permute.xlu1 %87  ;;  %1292 = vrot.lane.b32.xlu0 %v2487_v53, %s2333_s28 }
  0xc5   :  { %v94_v60 = vsel %vm89_vm6, %v84_v28, %v86_v57  ;;  %v95_v61 = vsel %vm89_vm6, %v86_v57, %v88_v58  ;;  %v261_v62 = vld [vmem:[#allocation2 + $0x98] sm:$0xff] }
  0xc6   :  { %v260_v63 = vld [vmem:[#allocation2 + $0x18] sm:$0xff]  ;;  %106 = vst [vmem:[#allocation2 + $0x60] sm:$0xf0] %v94_v60  ;;  %107 = vst [vmem:[#allocation2 + $0x28] sm:$0xf0] %v95_v61  ;;  %481 = vmatprep.subr.mxu0 %v261_v62 }
  0xc7   :  { %1258 = vst [vmem:[#allocation2 + $0x98] sm:$0xf0] %v2572_v59  ;;  %1257 = vst [vmem:[#allocation2 + $0x18] sm:$0xf0] %v2522_v18  ;;  %482 = vmatpush1.msra.mxu0 %v260_v63 }
  0xc8   :  { %1222 = vrot.lane.b32.xlu0 %v2469_v43, %s2334_s29 }
  0xcc   :  { %1332 = vrot.lane.b32.xlu0 %v2641_v36, %s2332_s25 }
  0xcd   :  { %v255_v0 = vld [vmem:[#allocation2 + $0x28] sm:$0xff]  ;;  %v254_v1 = vld [vmem:[#allocation2 + $0x60] sm:$0xff] }
  0xce   :  { %483 = vmatprep.subr.mxu0 %v255_v0 }
  0xcf   :  { %484 = vmatpush1.msra.mxu0 %v254_v1 }
  0xd0   :  { %2212 = vmatmul.mubr.msk.f32.vlgmr.msra.gmra.mxu0 %vm274_vm7, %v2514_v14  ;;  %1152 = vrot.lane.b32.xlu0 %v1147_v37, %s2335_s30 }
  0xd1   :  { %522 = vmatprep.mubr.f32.mxu0 %v2337_v12  ;;  %v2586_v6 = vpop.permute.xlu0 %531 }
  0xd4   :  { %2213 = vmatmul.mubr.msk.f32.gmra.mxu0 %vm274_vm7, %v2534_v22  ;;  %1188 = vrot.lane.b32.xlu0 %v2487_v53, %s2336_s6 }
  0xd5   :  { %805 = vmatprep.mubr.f32.mxu0 %v2337_v12 }
  0xd8   :  { %1266 = vrot.lane.b32.xlu0 %v2522_v18, %s2331_s24 }
  0xdc   :  { %1298 = vrot.lane.b32.xlu0 %v2528_v21, %s2333_s28 }
  0xe0   :  { %1150 = vrot.lane.b32.xlu0 %v2487_v53, %s2335_s30 }
  0xe4   :  { %1224 = vrot.lane.b32.xlu0 %v1148_v35, %s2334_s29 }
  0xe8   :  { %1334 = vrot.lane.b32.xlu0 %v2568_v56, %s2332_s25 }
  0xec   :  { %1156 = vrot.lane.b32.xlu0 %v1148_v35, %s2335_s30 }
  0xf0   :  { %1192 = vrot.lane.b32.xlu0 %v2469_v43, %s2336_s6 }
  0xf4   :  { %1270 = vrot.lane.b32.xlu0 %v2568_v56, %s2331_s24 }
  0xf8   :  { %1302 = vrot.lane.b32.xlu0 %v2572_v59, %s2333_s28 }
  0xfc   :  { %1228 = vrot.lane.b32.xlu0 %v2641_v36, %s2334_s29 }
 0x12a   :  { %v2673_v48 = vpop.permute.xlu0 %1328 }
 0x12e   :  { %v1265_v49 = vpop.permute.xlu0 %1264 }
 0x132   :  { %v2677_v50 = vpop.permute.xlu0 %1296 }
 0x136   :  { %v1293_v51 = vpop.permute.xlu0 %1292 }
 0x13a   :  { %v2682_v52 = vpop.permute.xlu0 %1222 }
 0x13e   :  { %v2686_v54 = vpop.permute.xlu0 %1332 }
 0x142   :  { %v2689_v55 = vpop.permute.xlu0 %1152 }
 0x146   :  { %v2692_v57 = vpop.permute.xlu0 %1188 }
 0x14a   :  { %v2696_v58 = vpop.permute.xlu0 %1266 }
 0x14b   :  { %v1276_v60 = vsel %vm165_vm1, %v1265_v49, %v2696_v58 }
 0x14c   :  { %1288 = vst [vmem:[#allocation2 + $0x70] sm:$0xf] %v1276_v60 }
 0x14e   :  { %v2702_v61 = vpop.permute.xlu0 %1298 }
 0x14f   :  { %v1308_v62 = vsel %vm198_vm2, %v2677_v50, %v2702_v61 }
 0x150   :  { %1320 = vst [vmem:[#allocation2 + $0x70] sm:$0xf0] %v1308_v62 }
 0x152   :  { %v1151_v63 = vpop.permute.xlu0 %1150 }
 0x153   :  { %v1164_v0 = vsel %vm52_vm5, %v1151_v63, %v2689_v55 }
 0x154   :  { %1176 = vst [vmem:[#allocation2 + $0xb0] sm:$0xf] %v1164_v0 }
 0x156   :  { %v2715_v1 = vpop.permute.xlu0 %1224 }
 0x16b   :  { %v366_v2 = vpop.f32.mrf.mxu0 }
 0x16c   :  { %v2724_v2 = vpop.permute.xlu0 %1334 }
 0x16d   :  { %v2591_v9 = vpop.f32.mrf.mxu0  ;;  %v1342_v3 = vsel %vm231_vm0, %v2686_v54, %v2724_v2 }
 0x16e   :  { %v534_v10 = vadd.f32 %v2586_v6, %v2591_v9  ;;  %1354 = vst [vmem:[#allocation2 + $0x20] sm:$0xf] %v1342_v3 }
 0x16f   :  { %v2608_v20 = vpop.f32.mrf.mxu0 }
 0x170   :  { %v559_v17 = vmul.f32 %v2596_v11, %v534_v10 }
 0x171   :  { %v2612_v26 = vpop.f32.mrf.mxu0 }
 0x17c   :  { %v2600_v15 = vpop.f32.mrf.mxu1 }
 0x17d   :  { %v535_v16 = vadd.f32 %v2586_v6, %v2600_v15 }
 0x17e   :  { %v2610_v25 = vpop.f32.mrf.mxu1 }
 0x17f   :  { %v560_v19 = vmul.f32 %v2598_v13, %v535_v16  ;;  %v536_v28 = vadd.f32 %v2586_v6, %v2610_v25 }
 0x180   :  { %v2668_v38 = vpop.f32.mrf.mxu1 }
 0x181   :  { %603 = vmatprep.subr.mxu1 %v560_v19  ;;  %637 = vmatprep.mubr.f32.mxu1 %v560_v19  ;;  %v561_v34 = vmul.f32 %v2618_v29, %v536_v28 }
 0x182   :  { %604 = vmatpush1.xpose.msra.mxu1 %v559_v17  ;;  %2214 = vmatprep.subr.msk.mxu0 %vm281_vm3, %v560_v19  ;;  %v2670_v39 = vpop.f32.mrf.mxu1 }
 0x183   :  { %2215 = vmatpush1.msk.msra.mxu0 %vm281_vm3, %v559_v17 }
 0x185   :  { %638 = vmatmul.mubr.f32.vlgmr.msra.gmra.mxu1 %v559_v17 }
 0x190   :  { %v2620_v30 = vpop.f32.mrf.mxu0 }
 0x191   :  { %v537_v31 = vadd.f32 %v2586_v6, %v2620_v30 }
 0x192   :  { %v521_v32 = vpop.f32.mrf.mxu0 }
 0x193   :  { %v562_v33 = vmul.f32 %v2614_v27, %v537_v31 }
 0x195   :  { %673 = vmatprep.subr.mxu1 %v562_v33  ;;  %707 = vmatprep.mubr.f32.mxu1 %v562_v33 }
 0x196   :  { %674 = vmatpush1.xpose.msra.mxu1 %v561_v34 }
 0x197   :  { %2217 = vmatprep.subr.msk.mxu1 %vm281_vm3, %v562_v33 }
 0x199   :  { %708 = vmatmul.mubr.f32.vlgmr.msra.gmra.mxu1 %v561_v34 }
 0x19a   :  { %2218 = vmatpush1.msk.msra.mxu1 %vm281_vm3, %v561_v34  ;;  %876 = vmatprep.mubr.f32.mxu1 %v2337_v12 }
 0x245   :  { %v639_v40 = vpop.f32.mrf.mxu1 }
 0x247   :  { %v641_v41 = vpop.f32.mrf.mxu1 }
 0x259   :  { %v709_v42 = vpop.f32.mrf.mxu1 }
 0x25a   :  { %v710_v44 = vadd.f32 %v709_v42, %v639_v40  ;;  %v1157_v42 = vpop.permute.xlu0 %1156 }
 0x25b   :  { %v711_v45 = vpop.f32.mrf.mxu1 }
 0x25c   :  { %v714_v47 = vsel %vm713_vm8, %v710_v44, -inf }
 0x25d   :  { %715 = vmax.xlane.f32.xlu1 %v714_v47 }
 0x26e   :  { %1326 = vrot.lane.b32.xlu1 %v2469_v43, %s2332_s25 }
 0x272   :  { %1324 = vrot.lane.b32.xlu1 %v1147_v37, %s2332_s25 }
 0x276   :  { %1262 = vrot.lane.b32.xlu1 %v2469_v43, %s2331_s24 }
 0x27a   :  { %1294 = vrot.lane.b32.xlu1 %v2475_v46, %s2333_s28 }
 0x27e   :  { %1260 = vrot.lane.b32.xlu1 %v1147_v37, %s2331_s24 }
 0x282   :  { %1220 = vrot.lane.b32.xlu1 %v1147_v37, %s2334_s29 }
 0x286   :  { %1330 = vrot.lane.b32.xlu1 %v2522_v18, %s2332_s25 }
 0x28a   :  { %1218 = vrot.lane.b32.xlu1 %v2487_v53, %s2334_s29 }
 0x28e   :  { %1154 = vrot.lane.b32.xlu1 %v2469_v43, %s2335_s30  ;;  %v1234_v43 = vsel %vm122_vm4, %v2682_v52, %v2715_v1 }
 0x28f   :  { %1246 = vst [vmem:[#allocation2 + $0x88] sm:$0xf] %v1234_v43 }
 0x292   :  { %1190 = vrot.lane.b32.xlu1 %v2475_v46, %s2336_s6  ;;  %v1182_v46 = vcombine.low %v2487_v53, %v2487_v53  ;;  %v890_v53 = vrot.slane %v2668_v38, 1 }
 0x296   :  { %1268 = vrot.lane.b32.xlu1 %v2641_v36, %s2331_s24 }
 0x29a   :  { %1300 = vrot.lane.b32.xlu1 %v2522_v18, %s2333_s28 }
 0x29e   :  { %1186 = vrot.lane.b32.xlu1 %v1182_v46, %s2336_s6 }
 0x2a2   :  { %1226 = vrot.lane.b32.xlu1 %v2522_v18, %s2334_s29 }
 0x2a6   :  { %1336 = vrot.lane.b32.xlu1 %v1259_v4, %s2332_s25 }
 0x2aa   :  { %1158 = vrot.lane.b32.xlu1 %v2522_v18, %s2335_s30 }
 0x2ae   :  { %1194 = vrot.lane.b32.xlu1 %v2528_v21, %s2336_s6 }
 0x2b2   :  { %1272 = vrot.lane.b32.xlu1 %v1259_v4, %s2331_s24 }
 0x2b6   :  { %1304 = vrot.lane.b32.xlu1 %v2568_v56, %s2333_s28 }
 0x2ba   :  { %1230 = vrot.lane.b32.xlu1 %v2568_v56, %s2334_s29 }
 0x2be   :  { %1162 = vrot.lane.b32.xlu1 %v2568_v56, %s2335_s30 }
 0x2c2   :  { %1198 = vrot.lane.b32.xlu1 %v2572_v59, %s2336_s6 }
 0x2c6   :  { %897 = vrot.lane.b32.xlu1 %v890_v53, %s2339_s1 }
 0x2e6   :  { %v716_v21 = vpop.xlane.xlu1 %715 }
 0x2e7   :  { %v717_v7 = vsub.f32 %v710_v44, %v716_v21 }
 0x2e9   :  { %v718_v8 = vmul.f32 1.442695, %v717_v7 }
 0x2ea   :  { %v1327_v10 = vpop.permute.xlu1 %1326 }
 0x2eb   :  { %2283 = vpow2.f32 %v718_v8  ;;  %v1339_v16 = vsel %vm231_vm0, %v1327_v10, %v2673_v48 }
 0x2ec   :  { %1351 = vst [vmem:[#allocation2 + $0x58] sm:$0xf] %v1339_v16 }
 0x2ee   :  { %v1325_v17 = vpop.permute.xlu1 %1324 }
 0x2ef   :  { %v1338_v56 = vsel %vm231_vm0, %v1325_v17, %v1327_v10 }
 0x2f0   :  { %1350 = vst [vmem:[#allocation2 + $0x30] sm:$0xf] %v1338_v56  ;;  %v2794_v56 = vpop.f32.mrf.mxu0 }
 0x2f2   :  { %v1263_v19 = vpop.permute.xlu1 %1262 }
 0x2f3   :  { %v1275_v59 = vsel %vm165_vm1, %v1263_v19, %v1265_v49  ;;  %v1375_v23 = vld [vmem:[#allocation2 + $0x58] sm:$0xf] }
 0x2f4   :  { %1287 = vst [vmem:[#allocation2 + $0x50] sm:$0xf] %v1275_v59  ;;  %2229 = vmatprep.subr.msk.mxu0 %vm281_vm3, %v1375_v23 }
 0x2f6   :  { %v1295_v24 = vpop.permute.xlu1 %1294 }
 0x2f7   :  { %v1306_v28 = vsel %vm198_vm2, %v1293_v51, %v1295_v24  ;;  %v1307_v31 = vsel %vm198_vm2, %v1295_v24, %v2677_v50  ;;  %v1193_v50 = vpop.permute.xlu0 %1192 }
 0x2f8   :  { %v2758_v32 = vpop.eup %2283  ;;  %1318 = vst [vmem:[#allocation2 + $0x38] sm:$0xf0] %v1306_v28  ;;  %1319 = vst [vmem:[#allocation2 + $0x50] sm:$0xf0] %v1307_v31 }
 0x2f9   :  { %v720_v33 = vsel %vm713_vm8, %v2758_v32, 0.0 }
 0x2fa   :  { %721 = vadd.xlane.f32.xlu0 %v720_v33  ;;  %v1261_v34 = vpop.permute.xlu1 %1260 }
 0x2fb   :  { %v1274_v35 = vsel %vm165_vm1, %v1261_v34, %v1263_v19  ;;  %v892_v19 = vrot.slane %v2794_v56, 1 }
 0x2fc   :  { %1286 = vst [vmem:[#allocation2 + $0x38] sm:$0xf] %v1274_v35 }
 0x2fd   :  { %901 = vrot.lane.b32.xlu1 %v892_v19, %s2339_s1 }
 0x2fe   :  { %v1221_v37 = vpop.permute.xlu1 %1220 }
 0x2ff   :  { %v1233_v40 = vsel %vm122_vm4, %v1221_v37, %v2682_v52 }
 0x300   :  { %1245 = vst [vmem:[#allocation2 + $0x78] sm:$0xf] %v1233_v40 }
 0x302   :  { %v1331_v41 = vpop.permute.xlu1 %1330 }
 0x303   :  { %v1340_v44 = vsel %vm231_vm0, %v2673_v48, %v1331_v41  ;;  %v1341_v45 = vsel %vm231_vm0, %v1331_v41, %v2686_v54  ;;  %v1271_v54 = vpop.permute.xlu0 %1270 }
 0x304   :  { %1352 = vst [vmem:[#allocation2 + $0x80] sm:$0xf] %v1340_v44  ;;  %1353 = vst [vmem:[#allocation2 + $0xb8] sm:$0xf] %v1341_v45 }
 0x306   :  { %v1219_v47 = vpop.permute.xlu1 %1218 }
 0x307   :  { %v1232_v49 = vsel %vm122_vm4, %v1219_v47, %v1221_v37  ;;  %v1303_v3 = vpop.permute.xlu0 %1302 }
 0x308   :  { %1244 = vst [vmem:[#allocation2 + $0x40] sm:$0xf] %v1232_v49 }
 0x30a   :  { %v1155_v51 = vpop.permute.xlu1 %1154 }
 0x30b   :  { %v1165_v52 = vsel %vm52_vm5, %v2689_v55, %v1155_v51  ;;  %v1377_v60 = vld [vmem:[#allocation2 + $0xb8] sm:$0xf]  ;;  %v1166_v62 = vsel %vm52_vm5, %v1155_v51, %v1157_v42  ;;  %v1229_v7 = vpop.permute.xlu0 %1228  ;;  %v1374_v51 = vld [vmem:[#allocation2 + $0x30] sm:$0xf] }
 0x30c   :  { %1177 = vst [vmem:[#allocation2] sm:$0xf] %v1165_v52  ;;  %2233 = vmatprep.subr.msk.mxu1 %vm281_vm3, %v1377_v60  ;;  %1178 = vst [vmem:[#allocation2 + $0x10] sm:$0xf] %v1166_v62  ;;  %v1376_v52 = vld [vmem:[#allocation2 + $0x80] sm:$0xf] }
 0x30d   :  { %v1369_v60 = vld [vmem:[#allocation2 + $0x50] sm:$0xff] }
 0x30e   :  { %v1191_v48 = vpop.permute.xlu1 %1190 }
 0x30f   :  { %v1201_v63 = vsel %vm89_vm6, %v2692_v57, %v1191_v48  ;;  %v1202_v0 = vsel %vm89_vm6, %v1191_v48, %v1193_v50  ;;  %v1368_v48 = vld [vmem:[#allocation2 + $0x38] sm:$0xff] }
 0x310   :  { %1213 = vst [vmem:[#allocation2] sm:$0xf0] %v1201_v63  ;;  %1160 = vrot.lane.b32.xlu0 %v2641_v36, %s2335_s30  ;;  %1214 = vst [vmem:[#allocation2 + $0x10] sm:$0xf0] %v1202_v0  ;;  %v1363_v63 = vld [vmem:[#allocation2 + $0x78] sm:$0xff]  ;;  %v1362_v0 = vld [vmem:[#allocation2 + $0x40] sm:$0xff] }
 0x312   :  { %v1269_v55 = vpop.permute.xlu1 %1268 }
 0x313   :  { %v1277_v43 = vsel %vm165_vm1, %v2696_v58, %v1269_v55  ;;  %v1278_v46 = vsel %vm165_vm1, %v1269_v55, %v1271_v54  ;;  %v1364_v55 = vld [vmem:[#allocation2 + $0x88] sm:$0xff] }
 0x314   :  { %1289 = vst [vmem:[#allocation2 + $0xa0] sm:$0xf] %v1277_v43  ;;  %1196 = vrot.lane.b32.xlu0 %v2522_v18, %s2336_s6  ;;  %1290 = vst [vmem:[#allocation2 + $0xa8] sm:$0xf] %v1278_v46 }
 0x316   :  { %v1301_v4 = vpop.permute.xlu1 %1300 }
 0x317   :  { %v1309_v53 = vsel %vm198_vm2, %v2702_v61, %v1301_v4  ;;  %v1310_v21 = vsel %vm198_vm2, %v1301_v4, %v1303_v3  ;;  %v1357_v43 = vld [vmem:[#allocation2] sm:$0xff]  ;;  %v1358_v4 = vld [vmem:[#allocation2 + $0x10] sm:$0xff] }
 0x318   :  { %1321 = vst [vmem:[#allocation2 + $0xa0] sm:$0xf0] %v1309_v53  ;;  %1322 = vst [vmem:[#allocation2 + $0xa8] sm:$0xf0] %v1310_v21  ;;  %v1378_v21 = vld [vmem:[#allocation2 + $0x20] sm:$0xf] }
 0x31a   :  { %v1187_v36 = vpop.permute.xlu1 %1186 }
 0x31b   :  { %v1200_v58 = vsel %vm89_vm6, %v1187_v36, %v2692_v57 }
 0x31c   :  { %1212 = vst [vmem:[#allocation2 + $0xb0] sm:$0xf0] %v1200_v58 }
 0x31e   :  { %v1227_v8 = vpop.permute.xlu1 %1226 }
 0x31f   :  { %v1235_v18 = vsel %vm122_vm4, %v2715_v1, %v1227_v8  ;;  %v1236_v10 = vsel %vm122_vm4, %v1227_v8, %v1229_v7  ;;  %v1371_v62 = vld [vmem:[#allocation2 + $0xa0] sm:$0xff]  ;;  %v1372_v58 = vld [vmem:[#allocation2 + $0xa8] sm:$0xff] }
 0x320   :  { %1247 = vst [vmem:[#allocation2 + $0x90] sm:$0xf] %v1235_v18  ;;  %1248 = vst [vmem:[#allocation2 + $0x18] sm:$0xf] %v1236_v10 }
 0x322   :  { %v1337_v16 = vpop.permute.xlu1 %1336 }
 0x323   :  { %v1343_v61 = vsel %vm231_vm0, %v2724_v2, %v1337_v16  ;;  %v2833_v16 = vpop.f32.mrf.mxu0 }
 0x324   :  { %1355 = vst [vmem:[#allocation2 + $0x8] sm:$0xf] %v1343_v61 }
 0x326   :  { %v1159_v17 = vpop.permute.xlu1 %1158 }
 0x327   :  { %v1167_v57 = vsel %vm52_vm5, %v1157_v42, %v1159_v17  ;;  %v1366_v8 = vld [vmem:[#allocation2 + $0x18] sm:$0xff] }
 0x328   :  { %1179 = vst [vmem:[#allocation2 + $0x48] sm:$0xf] %v1167_v57 }
 0x32a   :  { %v1195_v1 = vpop.permute.xlu1 %1194 }
 0x32b   :  { %v1203_v59 = vsel %vm89_vm6, %v1193_v50, %v1195_v1  ;;  %v1379_v53 = vld [vmem:[#allocation2 + $0x8] sm:$0xf] }
 0x32c   :  { %1215 = vst [vmem:[#allocation2 + $0x48] sm:$0xf0] %v1203_v59 }
 0x32e   :  { %v1273_v23 = vpop.permute.xlu1 %1272 }
 0x32f   :  { %v1279_v24 = vsel %vm165_vm1, %v1271_v54, %v1273_v23  ;;  %v1370_v54 = vld [vmem:[#allocation2 + $0x70] sm:$0xff] }
 0x330   :  { %1291 = vst [vmem:[#allocation2 + $0x68] sm:$0xf] %v1279_v24 }
 0x332   :  { %v1305_v2 = vpop.permute.xlu1 %1304 }
 0x333   :  { %v1311_v28 = vsel %vm198_vm2, %v1303_v3, %v1305_v2  ;;  %v1359_v46 = vld [vmem:[#allocation2 + $0x48] sm:$0xff]  ;;  %v1356_v3 = vld [vmem:[#allocation2 + $0xb0] sm:$0xff] }
 0x334   :  { %1323 = vst [vmem:[#allocation2 + $0x68] sm:$0xf0] %v1311_v28 }
 0x336   :  { %v1231_v31 = vpop.permute.xlu1 %1230 }
 0x337   :  { %v1237_v33 = vsel %vm122_vm4, %v1229_v7, %v1231_v31 }
 0x338   :  { %1249 = vst [vmem:[#allocation2 + $0x98] sm:$0xf] %v1237_v33 }
 0x33a   :  { %v1163_v35 = vpop.permute.xlu1 %1162 }
 0x33b   :  { %v1373_v36 = vld [vmem:[#allocation2 + $0x68] sm:$0xff] }
 0x33e   :  { %v1199_v42 = vpop.permute.xlu1 %1198 }
 0x33f   :  { %v1367_v7 = vld [vmem:[#allocation2 + $0x98] sm:$0xff] }
 0x383   :  { %v722_v34 = vpop.xlane.xlu0 %721 }
 0x384   :  { %2285 = vrcp.f32 %v722_v34 }
 0x387   :  { %v1161_v37 = vpop.permute.xlu0 %1160 }
 0x388   :  { %v1168_v40 = vsel %vm52_vm5, %v1159_v17, %v1161_v37  ;;  %v1169_v41 = vsel %vm52_vm5, %v1161_v37, %v1163_v35 }
 0x389   :  { %1180 = vst [vmem:[#allocation2 + $0x60] sm:$0xf] %v1168_v40  ;;  %1181 = vst [vmem:[#allocation2 + $0x28] sm:$0xf] %v1169_v41 }
 0x38b   :  { %v1197_v44 = vpop.permute.xlu0 %1196 }
 0x38c   :  { %v1204_v45 = vsel %vm89_vm6, %v1195_v1, %v1197_v44  ;;  %v1205_v47 = vsel %vm89_vm6, %v1197_v44, %v1199_v42 }
 0x38d   :  { %1216 = vst [vmem:[#allocation2 + $0x60] sm:$0xf0] %v1204_v45  ;;  %1217 = vst [vmem:[#allocation2 + $0x28] sm:$0xf0] %v1205_v47 }
 0x391   :  { %v2286_v49 = vpop.eup %2285 }
 0x392   :  { %v724_v50 = vmul.f32 %v2286_v49, %v2758_v32  ;;  %v1365_v32 = vld [vmem:[#allocation2 + $0x90] sm:$0xff]  ;;  %v889_v49 = vrot.slane %v2612_v26, 1 }
 0x394   :  { %2216 = vmatmul.mubr.msk.f32.vlgmr.msra.gmra.mxu0 %vm725_vm9, %v724_v50  ;;  %2219 = vmatmul.mubr.msk.f32.vlgmr.msra.gmra.mxu1 %vm725_vm9, %v724_v50  ;;  %v1361_v18 = vld [vmem:[#allocation2 + $0x28] sm:$0xff]  ;;  %v1360_v10 = vld [vmem:[#allocation2 + $0x60] sm:$0xff]  ;;  %v891_v50 = vrot.slane %v2670_v39, 1 }
 0x395   :  { %2230 = vmatpush1.msk.msra.mxu0 %vm281_vm3, %v1374_v51  ;;  %2234 = vmatpush1.msk.msra.mxu1 %vm281_vm3, %v1376_v52 }
 0x396   :  { %1424 = vmatprep.subr.mxu0 %v1369_v60  ;;  %1500 = vmatprep.subr.mxu1 %v1371_v62  ;;  %v964_v62 = vrot.slane %v2612_v26, 2 }
 0x397   :  { %1425 = vmatpush1.msra.mxu0 %v1368_v48  ;;  %1501 = vmatpush1.msra.mxu1 %v1370_v54  ;;  %v966_v48 = vrot.slane %v2670_v39, 2  ;;  %v968_v54 = vrot.slane %v2833_v16, 2 }
 0x398   :  { %1426 = vmatprep.subr.mxu0 %v1363_v63  ;;  %1502 = vmatprep.subr.mxu1 %v1365_v32 }
 0x399   :  { %1427 = vmatpush1.msra.mxu0 %v1362_v0  ;;  %1503 = vmatpush1.msra.mxu1 %v1364_v55  ;;  %v888_v0 = vrot.slane %v2608_v20, 1 }
 0x39a   :  { %1428 = vmatprep.subr.mxu0 %v1357_v43  ;;  %1504 = vmatprep.subr.mxu1 %v1359_v46 }
 0x39b   :  { %1429 = vmatpush1.msra.mxu0 %v1356_v3  ;;  %1462 = vmatprep.mubr.f32.mxu0 %v2337_v12 }
 0x39c   :  { %1505 = vmatpush1.msra.mxu1 %v1358_v4  ;;  %1538 = vmatprep.mubr.f32.mxu1 %v2337_v12  ;;  %v898_v4 = vpop.permute.xlu1 %897 }
 0x39d   :  { %2231 = vmatmul.mubr.msk.f32.vlgmr.msra.gmra.mxu0 %vm274_vm7, %v2514_v14  ;;  %2235 = vmatmul.mubr.msk.f32.vlgmr.msra.gmra.mxu1 %vm274_vm7, %v2514_v14 }
 0x39e   :  { %2237 = vmatprep.subr.msk.mxu0 %vm281_vm3, %v1379_v53  ;;  %1467 = vmatprep.mubr.f32.mxu0 %v2337_v12 }
 0x39f   :  { %2238 = vmatpush1.msk.msra.mxu0 %vm281_vm3, %v1378_v21  ;;  %1544 = vmatprep.mubr.f32.mxu1 %v2337_v12 }
 0x3a0   :  { %1577 = vmatprep.subr.mxu0 %v1373_v36 }
 0x3a1   :  { %1578 = vmatpush1.msra.mxu0 %v1372_v58  ;;  %2236 = vmatmul.mubr.msk.f32.gmra.mxu1 %vm274_vm7, %v2534_v22  ;;  %v2905_v58 = vpop.permute.xlu1 %901 }
 0x3a2   :  { %2232 = vmatmul.mubr.msk.f32.gmra.mxu0 %vm274_vm7, %v2534_v22  ;;  %1579 = vmatprep.subr.mxu0 %v1367_v7 }
 0x3a3   :  { %1580 = vmatpush1.msra.mxu0 %v1366_v8  ;;  %1615 = vmatprep.mubr.f32.mxu0 %v2337_v12 }
 0x3a4   :  { %1581 = vmatprep.subr.mxu0 %v1361_v18  ;;  %v2914_v18 = vadd.f32 %v2905_v58, %v2794_v56 }
 0x3a5   :  { %1582 = vmatpush1.msra.mxu0 %v1360_v10 }
 0x3a6   :  { %2239 = vmatmul.mubr.msk.f32.vlgmr.msra.gmra.mxu0 %vm274_vm7, %v2514_v14 }
 0x3a7   :  { %1620 = vmatprep.mubr.f32.mxu0 %v2337_v12 }
 0x3aa   :  { %2240 = vmatmul.mubr.msk.f32.gmra.mxu0 %vm274_vm7, %v2534_v22 }
 0x3ab   :  { %1869 = vmatprep.mubr.f32.mxu0 %v2337_v12 }
 0x454   :  { %v2835_v61 = vpop.f32.mrf.mxu0  ;;  %v2837_v17 = vpop.f32.mrf.mxu1 }
 0x456   :  { %v2839_v57 = vpop.f32.mrf.mxu0  ;;  %v2841_v19 = vpop.f32.mrf.mxu1 }
 0x45d   :  { %v1464_v1 = vpop.f32.mrf.mxu0  ;;  %v2843_v59 = vpop.f32.mrf.mxu1 }
 0x45e   :  { %v1628_v14 = vadd.f32 %v2843_v59, %v2586_v6  ;;  %v929_v1 = vrot.slane %v2914_v18, 2 }
 0x45f   :  { %v2847_v23 = vpop.f32.mrf.mxu0  ;;  %v2855_v31 = vpop.f32.mrf.mxu1 }
 0x460   :  { %v1632_v22 = vmul.f32 %v1628_v14, %v2598_v13  ;;  %v1627_v24 = vadd.f32 %v2847_v23, %v2586_v6  ;;  %v1629_v13 = vadd.f32 %v2855_v31, %v2586_v6 }
 0x461   :  { %v2872_v41 = vpop.f32.mrf.mxu1 }
 0x462   :  { %v1631_v2 = vmul.f32 %v1627_v24, %v2596_v11  ;;  %v2853_v28 = vpop.f32.mrf.mxu0  ;;  %1669 = vmatprep.subr.mxu1 %v1632_v22  ;;  %1703 = vmatprep.mubr.f32.mxu1 %v1632_v22  ;;  %v1633_v40 = vmul.f32 %v1629_v13, %v2618_v29  ;;  %v1954_v52 = vrot.slane %v2872_v41, 1  ;;  %v2027_v63 = vrot.slane %v2872_v41, 2 }
 0x463   :  { %2241 = vmatprep.subr.msk.mxu0 %vm281_vm3, %v1632_v22  ;;  %v2874_v42 = vpop.f32.mrf.mxu1 }
 0x464   :  { %v2858_v33 = vpop.f32.mrf.mxu0  ;;  %1670 = vmatpush1.xpose.msra.mxu1 %v1631_v2  ;;  %2242 = vmatpush1.msk.msra.mxu0 %vm281_vm3, %v1631_v2  ;;  %v1955_v13 = vrot.slane %v2874_v42, 1 }
 0x465   :  { %v1953_v24 = vrot.slane %v2858_v33, 1 }
 0x466   :  { %v2863_v34 = vpop.f32.mrf.mxu0 }
 0x467   :  { %v1630_v11 = vadd.f32 %v2863_v34, %v2586_v6  ;;  %1704 = vmatmul.mubr.f32.vlgmr.msra.gmra.mxu1 %v1631_v2 }
 0x468   :  { %v1619_v35 = vpop.f32.mrf.mxu0 }
 0x469   :  { %v1634_v37 = vmul.f32 %v1630_v11, %v2614_v27  ;;  %v965_v35 = vrot.slane %v2668_v38, 2 }
 0x46a   :  { %v2883_v51 = vpop.f32.mrf.mxu0 }
 0x46b   :  { %1739 = vmatprep.subr.mxu1 %v1634_v37  ;;  %1773 = vmatprep.mubr.f32.mxu1 %v1634_v37  ;;  %v1956_v60 = vrot.slane %v2883_v51, 1  ;;  %v2029_v32 = vrot.slane %v2883_v51, 2 }
 0x46c   :  { %1740 = vmatpush1.xpose.msra.mxu1 %v1633_v40  ;;  %v2923_v2 = vpop.f32.mrf.mxu0 }
 0x46d   :  { %2244 = vmatprep.subr.msk.mxu1 %vm281_vm3, %v1634_v37  ;;  %v2018_v11 = vrot.slane %v2923_v2, 1  ;;  %v967_v37 = vrot.slane %v2794_v56, 2 }
 0x46f   :  { %1774 = vmatmul.mubr.f32.vlgmr.msra.gmra.mxu1 %v1633_v40 }
 0x470   :  { %2245 = vmatpush1.msk.msra.mxu1 %vm281_vm3, %v1633_v40  ;;  %1940 = vmatprep.mubr.f32.mxu1 %v2337_v12  ;;  %v956_v12 = vrot.slane %v2833_v16, 1  ;;  %v2026_v40 = vrot.slane %v2858_v33, 2 }
 0x527   :  { %v1705_v6 = vpop.f32.mrf.mxu1 }
 0x529   :  { %v1707_v44 = vpop.f32.mrf.mxu1 }
 0x52a   :  { %v2030_v44 = vrot.slane %v2923_v2, 2 }
 0x52f   :  { %v1775_v45 = vpop.f32.mrf.mxu1 }
 0x530   :  { %v1776_v27 = vadd.f32 %v1775_v45, %v1705_v6  ;;  %v2028_v6 = vrot.slane %v2874_v42, 2 }
 0x531   :  { %v1777_v47 = vpop.f32.mrf.mxu1 }
 0x532   :  { %v1779_v29 = vsel %vm713_vm8, %v1776_v27, -inf }
 0x533   :  { %1780 = vmax.xlane.f32.xlu0 %v1779_v29 }
 0x549   :  { %895 = vrot.lane.b32.xlu0 %v889_v49, %s2339_s1 }
 0x54d   :  { %899 = vrot.lane.b32.xlu0 %v891_v50, %s2339_s1 }
 0x551   :  { %957 = vrot.lane.b32.xlu0 %v956_v12, %s2339_s1 }
 0x555   :  { %1961 = vrot.lane.b32.xlu0 %v1954_v52, %s2339_s1 }
 0x559   :  { %1965 = vrot.lane.b32.xlu0 %v1956_v60, %s2339_s1 }
 0x55d   :  { %969 = vrot.lane.b32.xlu0 %v964_v62, %s2340_s21 }
 0x561   :  { %973 = vrot.lane.b32.xlu0 %v966_v48, %s2340_s21 }
 0x565   :  { %977 = vrot.lane.b32.xlu0 %v968_v54, %s2340_s21 }
 0x569   :  { %2033 = vrot.lane.b32.xlu0 %v2027_v63, %s2340_s21 }
 0x56d   :  { %2037 = vrot.lane.b32.xlu0 %v2029_v32, %s2340_s21 }
 0x571   :  { %893 = vrot.lane.b32.xlu0 %v888_v0, %s2339_s1 }
 0x5bc   :  { %v1781_v55 = vpop.xlane.xlu0 %1780 }
 0x5bd   :  { %v1782_v43 = vsub.f32 %v1776_v27, %v1781_v55 }
 0x5bf   :  { %v1783_v46 = vmul.f32 1.442695, %v1782_v43 }
 0x5c0   :  { %v2901_v3 = vpop.permute.xlu0 %895 }
 0x5c1   :  { %2287 = vpow2.f32 %v1783_v46  ;;  %v919_v53 = vadd.f32 %v2901_v3, %v2608_v20  ;;  %v905_v45 = vsel %vm903_vm10, %v2901_v3, %v898_v4 }
 0x5c2   :  { %v2943_v27 = vadd.f32 %v905_v45, %v2612_v26 }
 0x5c3   :  { %v925_v21 = vrot.slane %v919_v53, 2 }
 0x5c4   :  { %v900_v36 = vpop.permute.xlu0 %899  ;;  %v926_v49 = vrot.slane %v2943_v27, 2 }
 0x5c5   :  { %v906_v7 = vsel %vm903_vm10, %v898_v4, %v900_v36  ;;  %930 = vrot.lane.b32.xlu0 %v925_v21, %s2340_s21  ;;  %v907_v47 = vsel %vm903_vm10, %v900_v36, %v2905_v58 }
 0x5c6   :  { %v2910_v8 = vadd.f32 %v906_v7, %v2668_v38  ;;  %v1952_v38 = vrot.slane %v2853_v28, 1  ;;  %v2949_v29 = vadd.f32 %v907_v47, %v2670_v39 }
 0x5c8   :  { %v927_v10 = vrot.slane %v2910_v8, 2  ;;  %v928_v50 = vrot.slane %v2949_v29, 2  ;;  %v958_v12 = vpop.permute.xlu0 %957 }
 0x5c9   :  { %v963_v47 = vadd.f32 %v958_v12, %v2833_v16 }
 0x5ca   :  { %934 = vrot.lane.b32.xlu0 %v927_v10, %s2340_s21 }
 0x5cc   :  { %v1962_v52 = vpop.permute.xlu0 %1961 }
 0x5ce   :  { %v2288_v14 = vpop.eup %2287  ;;  %938 = vrot.lane.b32.xlu0 %v929_v1, %s2340_s21 }
 0x5cf   :  { %v1785_v22 = vsel %vm713_vm8, %v2288_v14, 0.0 }
 0x5d0   :  { %1786 = vadd.xlane.f32.xlu1 %v1785_v22  ;;  %v2955_v26 = vpop.permute.xlu0 %1965 }
 0x5d4   :  { %v970_v62 = vpop.permute.xlu0 %969 }
 0x5d8   :  { %v974_v4 = vpop.permute.xlu0 %973 }
 0x5dc   :  { %v978_v22 = vpop.permute.xlu0 %977 }
 0x5e1   :  { %1959 = vrot.lane.b32.xlu1 %v1953_v24, %s2339_s1 }
 0x5e5   :  { %1963 = vrot.lane.b32.xlu1 %v1955_v13, %s2339_s1  ;;  %v959_v13 = vsel %vm903_vm10, %v2905_v58, %v958_v12 }
 0x5e9   :  { %2019 = vrot.lane.b32.xlu1 %v2018_v11, %s2339_s1 }
 0x5ed   :  { %971 = vrot.lane.b32.xlu1 %v965_v35, %s2340_s21 }
 0x5f1   :  { %975 = vrot.lane.b32.xlu1 %v967_v37, %s2340_s21 }
 0x5f5   :  { %2031 = vrot.lane.b32.xlu1 %v2026_v40, %s2340_s21 }
 0x5f9   :  { %2035 = vrot.lane.b32.xlu1 %v2028_v6, %s2340_s21 }
 0x5fd   :  { %2039 = vrot.lane.b32.xlu1 %v2030_v44, %s2340_s21 }
 0x601   :  { %1957 = vrot.lane.b32.xlu1 %v1952_v38, %s2339_s1 }
 0x605   :  { %932 = vrot.lane.b32.xlu1 %v926_v49, %s2340_s21  ;;  %v2034_v49 = vpop.permute.xlu0 %2033 }
 0x609   :  { %936 = vrot.lane.b32.xlu1 %v928_v50, %s2340_s21  ;;  %v2038_v12 = vpop.permute.xlu0 %2037 }
 0x659   :  { %v1787_v60 = vpop.xlane.xlu1 %1786 }
 0x65a   :  { %2289 = vrcp.f32 %v1787_v60  ;;  %v992_v60 = vadd.f32 %v978_v22, %v963_v47 }
 0x65c   :  { %v1002_v16 = vrot.slane %v992_v60, 4 }
 0x65d   :  { %v2957_v48 = vpop.permute.xlu1 %1959 }
 0x65e   :  { %v1968_v39 = vsel %vm903_vm10, %v2957_v48, %v1962_v52  ;;  %v1982_v54 = vadd.f32 %v2957_v48, %v2853_v28 }
 0x65f   :  { %v2964_v63 = vadd.f32 %v1968_v39, %v2858_v33  ;;  %v2980_v33 = vadd.f32 %v2955_v26, %v2883_v51 }
 0x660   :  { %v1988_v32 = vrot.slane %v1982_v54, 2 }
 0x661   :  { %v1964_v0 = vpop.permute.xlu1 %1963  ;;  %v1989_v55 = vrot.slane %v2964_v63, 2 }
 0x662   :  { %v1969_v43 = vsel %vm903_vm10, %v1962_v52, %v1964_v0  ;;  %v1970_v46 = vsel %vm903_vm10, %v1964_v0, %v2955_v26  ;;  %1993 = vrot.lane.b32.xlu1 %v1988_v32, %s2340_s21 }
 0x663   :  { %v2972_v53 = vadd.f32 %v1969_v43, %v2872_v41  ;;  %v2975_v21 = vadd.f32 %v1970_v46, %v2874_v42  ;;  %1995 = vrot.lane.b32.xlu0 %v1989_v55, %s2340_s21  ;;  %v1992_v42 = vrot.slane %v2980_v33, 2 }
 0x665   :  { %v1990_v36 = vrot.slane %v2972_v53, 2  ;;  %v1991_v7 = vrot.slane %v2975_v21, 2  ;;  %v2020_v10 = vpop.permute.xlu1 %2019 }
 0x666   :  { %v2021_v43 = vsel %vm903_vm10, %v2955_v26, %v2020_v10 }
 0x667   :  { %v2290_v1 = vpop.eup %2289  ;;  %1999 = vrot.lane.b32.xlu0 %v1991_v7, %s2340_s21  ;;  %1997 = vrot.lane.b32.xlu1 %v1990_v36, %s2340_s21 }
 0x668   :  { %v1789_v41 = vmul.f32 %v2290_v1, %v2288_v14  ;;  %v962_v14 = vadd.f32 %v959_v13, %v2794_v56  ;;  %v2025_v1 = vadd.f32 %v2020_v10, %v2923_v2  ;;  %v894_v2 = vpop.permute.xlu0 %893 }
 0x669   :  { %v972_v24 = vpop.permute.xlu1 %971 }
 0x66a   :  { %v979_v11 = vsel %vm940_vm11, %v970_v62, %v972_v24  ;;  %v980_v35 = vsel %vm940_vm11, %v972_v24, %v974_v4  ;;  %2243 = vmatmul.mubr.msk.f32.vlgmr.msra.gmra.mxu0 %vm725_vm9, %v1789_v41  ;;  %2246 = vmatmul.mubr.msk.f32.vlgmr.msra.gmra.mxu1 %vm725_vm9, %v1789_v41  ;;  %v2024_v41 = vadd.f32 %v2021_v43, %v2883_v51  ;;  %v23_v51 = vld [vmem:[%s3113_s3 + $0x4] sm:$0xf] }
 0x66b   :  { %v988_v37 = vadd.f32 %v979_v11, %v2943_v27  ;;  %v989_v40 = vadd.f32 %v980_v35, %v2910_v8  ;;  %2001 = vrot.lane.b32.xlu1 %v1992_v42, %s2340_s21 }
 0x66d   :  { %v998_v6 = vrot.slane %v988_v37, 4  ;;  %v999_v44 = vrot.slane %v989_v40, 4  ;;  %v976_v45 = vpop.permute.xlu1 %975  ;;  %v931_v40 = vpop.permute.xlu0 %930 }
 0x66e   :  { %v981_v58 = vsel %vm940_vm11, %v974_v4, %v976_v45  ;;  %v982_v38 = vsel %vm940_vm11, %v976_v45, %v978_v22 }
 0x66f   :  { %v990_v50 = vadd.f32 %v981_v58, %v2949_v29  ;;  %v991_v52 = vadd.f32 %v982_v38, %v962_v14  ;;  %1005 = vrot.lane.b32.xlu1 %v999_v44, %s2341_s22  ;;  %1003 = vrot.lane.b32.xlu0 %v998_v6, %s2341_s22 }
 0x671   :  { %v1000_v56 = vrot.slane %v990_v50, 4  ;;  %v1001_v62 = vrot.slane %v991_v52, 4  ;;  %v2032_v39 = vpop.permute.xlu1 %2031  ;;  %v935_v6 = vpop.permute.xlu0 %934 }
 0x672   :  { %v2041_v54 = vsel %vm940_vm11, %v2032_v39, %v2034_v49 }
 0x673   :  { %v2050_v32 = vadd.f32 %v2041_v54, %v2964_v63  ;;  %1009 = vrot.lane.b32.xlu1 %v1001_v62, %s2341_s22  ;;  %1007 = vrot.lane.b32.xlu0 %v1000_v56, %s2341_s22 }
 0x675   :  { %v2060_v0 = vrot.slane %v2050_v32, 4  ;;  %v2036_v55 = vpop.permute.xlu1 %2035  ;;  %v939_v45 = vpop.permute.xlu0 %938  ;;  %v3034_v32 = vstv %s3116_s4  ;;  %s2342_s4 = smov 66  }
 0x676   :  { %v2042_v46 = vsel %vm940_vm11, %v2034_v49, %v2036_v55  ;;  %v2043_v4 = vsel %vm940_vm11, %v2036_v55, %v2038_v12  ;;  %v904_v49 = vsel %vm903_vm10, %v894_v2, %v2901_v3 }
 0x677   :  { %v2051_v36 = vadd.f32 %v2042_v46, %v2972_v53  ;;  %v2052_v7 = vadd.f32 %v2043_v4, %v2975_v21  ;;  %1011 = vrot.lane.b32.xlu0 %v1002_v16, %s2341_s22  ;;  %2065 = vrot.lane.b32.xlu1 %v2060_v0, %s2341_s22  ;;  %v913_v56 = vadd.f32 %v904_v49, %v2608_v20 }
 0x679   :  { %v2061_v42 = vrot.slane %v2051_v36, 4  ;;  %v2062_v22 = vrot.slane %v2052_v7, 4  ;;  %v2040_v24 = vpop.permute.xlu1 %2039 }
 0x67a   :  { %v2044_v26 = vsel %vm940_vm11, %v2038_v12, %v2040_v24  ;;  %v2054_v13 = vadd.f32 %v2040_v24, %v2025_v1 }
 0x67b   :  { %v2053_v11 = vadd.f32 %v2044_v26, %v2024_v41  ;;  %2069 = vrot.lane.b32.xlu1 %v2062_v22, %s2341_s22  ;;  %2067 = vrot.lane.b32.xlu0 %v2061_v42, %s2341_s22 }
 0x67c   :  { %v2064_v35 = vrot.slane %v2054_v13, 4 }
 0x67d   :  { %v2063_v37 = vrot.slane %v2053_v11, 4  ;;  %v1958_v10 = vpop.permute.xlu1 %1957 }
 0x67e   :  { %v1967_v43 = vsel %vm903_vm10, %v1958_v10, %v2957_v48 }
 0x67f   :  { %2073 = vrot.lane.b32.xlu1 %v2064_v35, %s2341_s22  ;;  %2071 = vrot.lane.b32.xlu0 %v2063_v37, %s2341_s22  ;;  %v1976_v22 = vadd.f32 %v1967_v43, %v2853_v28 }
 0x681   :  { %v933_v14 = vpop.permute.xlu1 %932 }
 0x682   :  { %v941_v50 = vsel %vm940_vm11, %v931_v40, %v933_v14  ;;  %v942_v62 = vsel %vm940_vm11, %v933_v14, %v935_v6 }
 0x683   :  { %565 = vperm.xlu0 %2266, %v23_v51   ;;  %v950_v39 = vadd.f32 %v941_v50, %v913_v56  ;;  %v951_v54 = vadd.f32 %v942_v62, %v2943_v27 }
 0x685   :  { %v937_v44 = vpop.permute.xlu1 %936 }
 0x686   :  { %v943_v3 = vsel %vm940_vm11, %v935_v6, %v937_v44  ;;  %v944_v0 = vsel %vm940_vm11, %v937_v44, %v939_v45 }
 0x687   :  { %v952_v4 = vadd.f32 %v943_v3, %v2910_v8  ;;  %v953_v36 = vadd.f32 %v944_v0, %v2949_v29  ;;  %v954_v8 = vadd.f32 %v939_v45, %v2914_v18 }
 0x6d4   :  { %v1994_v58 = vpop.permute.xlu1 %1993 }
 0x6d5   :  { %v1996_v38 = vpop.permute.xlu0 %1995 }
 0x6d6   :  { %v2003_v7 = vsel %vm940_vm11, %v1994_v58, %v1996_v38 }
 0x6d7   :  { %v2012_v37 = vadd.f32 %v2003_v7, %v1976_v22 }
 0x6d9   :  { %v1998_v47 = vpop.permute.xlu1 %1997  ;;  %v2000_v52 = vpop.permute.xlu0 %1999 }
 0x6da   :  { %v2004_v29 = vsel %vm940_vm11, %v1996_v38, %v1998_v47  ;;  %v2005_v40 = vsel %vm940_vm11, %v1998_v47, %v2000_v52 }
 0x6db   :  { %v2013_v18 = vadd.f32 %v2004_v29, %v2964_v63  ;;  %v2014_v38 = vadd.f32 %v2005_v40, %v2972_v53 }
 0x6dd   :  { %v2002_v60 = vpop.permute.xlu1 %2001 }
 0x6de   :  { %v2006_v50 = vsel %vm940_vm11, %v2000_v52, %v2002_v60  ;;  %v2016_v0 = vadd.f32 %v2002_v60, %v2980_v33 }
 0x6df   :  { %v2015_v53 = vadd.f32 %v2006_v50, %v2975_v21 }
 0x6e1   :  { %v1004_v16 = vpop.permute.xlu0 %1003  ;;  %v1006_v12 = vpop.permute.xlu1 %1005 }
 0x6e2   :  { %v1023_v55 = vadd.f32 %v1004_v16, %v950_v39  ;;  %v1014_v20 = vsel %vm1013_vm12, %v1004_v16, %v1006_v12 }
 0x6e3   :  { %v1024_v46 = vadd.f32 %v1014_v20, %v951_v54 }
 0x6e4   :  { %v1029_v27 = vadd.f32 %v3034_v32, %v1023_v55 }
 0x6e5   :  { %v1030_v1 = vadd.f32 %v3034_v32, %v1024_v46  ;;  %v1008_v41 = vpop.permute.xlu0 %1007  ;;  %v1010_v42 = vpop.permute.xlu1 %1009 }
 0x6e6   :  { %v2220_v24 = vmul.f32 -1.442695, %v1029_v27  ;;  %v1015_v26 = vsel %vm1013_vm12, %v1006_v12, %v1008_v41  ;;  %v1016_v48 = vsel %vm1013_vm12, %v1008_v41, %v1010_v42 }
 0x6e7   :  { %v2221_v13 = vmul.f32 -1.442695, %v1030_v1  ;;  %v1025_v11 = vadd.f32 %v1015_v26, %v952_v4  ;;  %v1026_v35 = vadd.f32 %v1016_v48, %v953_v36 }
 0x6e8   :  { %2291 = vpow2.f32 %v2220_v24 }
 0x6e9   :  { %2293 = vpow2.f32 %v2221_v13  ;;  %v1031_v51 = vadd.f32 %v3034_v32, %v1025_v11  ;;  %v1032_v2 = vadd.f32 %v3034_v32, %v1026_v35  ;;  %v1012_v28 = vpop.permute.xlu0 %1011  ;;  %v2066_v10 = vpop.permute.xlu1 %2065 }
 0x6ea   :  { %v1017_v14 = vsel %vm1013_vm12, %v1010_v42, %v1012_v28  ;;  %v2084_v6 = vadd.f32 %v2066_v10, %v2012_v37 }
 0x6eb   :  { %v2222_v44 = vmul.f32 -1.442695, %v1031_v51  ;;  %v2223_v58 = vmul.f32 -1.442695, %v1032_v2  ;;  %v1027_v49 = vadd.f32 %v1017_v14, %v954_v8 }
 0x6ec   :  { %v2089_v45 = vadd.f32 %v2084_v6, %v3034_v32 }
 0x6ed   :  { %2295 = vpow2.f32 %v2222_v44  ;;  %v1033_v56 = vadd.f32 %v3034_v32, %v1027_v49  ;;  %v2068_v62 = vpop.permute.xlu0 %2067  ;;  %v2070_v39 = vpop.permute.xlu1 %2069 }
 0x6ee   :  { %2297 = vpow2.f32 %v2223_v58  ;;  %v2247_v47 = vmul.f32 -1.442695, %v2089_v45  ;;  %v2075_v54 = vsel %vm1013_vm12, %v2066_v10, %v2068_v62  ;;  %v2076_v16 = vsel %vm1013_vm12, %v2068_v62, %v2070_v39 }
 0x6ef   :  { %v2224_v12 = vmul.f32 -1.442695, %v1033_v56  ;;  %v2085_v3 = vadd.f32 %v2075_v54, %v2013_v18  ;;  %v2086_v63 = vadd.f32 %v2076_v16, %v2014_v38 }
 0x6f0   :  { %2299 = vpow2.f32 %v2247_v47 }
 0x6f1   :  { %2301 = vpow2.f32 %v2224_v12  ;;  %v2090_v52 = vadd.f32 %v2085_v3, %v3034_v32  ;;  %v2091_v55 = vadd.f32 %v2086_v63, %v3034_v32  ;;  %v2072_v20 = vpop.permute.xlu0 %2071  ;;  %v2074_v43 = vpop.permute.xlu1 %2073 }
 0x6f2   :  { %v2077_v46 = vsel %vm1013_vm12, %v2070_v39, %v2072_v20  ;;  %v2078_v27 = vsel %vm1013_vm12, %v2072_v20, %v2074_v43 }
 0x6f3   :  { %v2248_v4 = vmul.f32 -1.442695, %v2090_v52  ;;  %v2249_v36 = vmul.f32 -1.442695, %v2091_v55  ;;  %v2087_v7 = vadd.f32 %v2077_v46, %v2015_v53  ;;  %v2088_v1 = vadd.f32 %v2078_v27, %v2016_v0 }
 0x6f5   :  { %v2292_v41 = vpop.eup %2291  ;;  %2303 = vpow2.f32 %v2248_v4  ;;  %v2092_v33 = vadd.f32 %v2087_v7, %v3034_v32  ;;  %v2093_v21 = vadd.f32 %v2088_v1, %v3034_v32 }
 0x6f6   :  { %v2294_v60 = vpop.eup %2293  ;;  %v1049_v42 = vadd.f32 1.0, %v2292_v41  ;;  %2305 = vpow2.f32 %v2249_v36 }
 0x6f7   :  { %v1050_v22 = vadd.f32 1.0, %v2294_v60  ;;  %v2250_v24 = vmul.f32 -1.442695, %v2092_v33  ;;  %v2251_v26 = vmul.f32 -1.442695, %v2093_v21 }
 0x6f8   :  { %2307 = vrcp.f32 %v1049_v42 }
 0x6f9   :  { %2309 = vrcp.f32 %v1050_v22 }
 0x6fa   :  { %v2296_v48 = vpop.eup %2295  ;;  %2311 = vpow2.f32 %v2250_v24 }
 0x6fb   :  { %v2298_v13 = vpop.eup %2297  ;;  %v1051_v11 = vadd.f32 1.0, %v2296_v48  ;;  %2313 = vpow2.f32 %v2251_v26 }
 0x6fc   :  { %v1052_v35 = vadd.f32 1.0, %v2298_v13 }
 0x6fd   :  { %v2300_v8 = vpop.eup %2299  ;;  %2315 = vrcp.f32 %v1051_v11 }
 0x6fe   :  { %v2302_v37 = vpop.eup %2301  ;;  %2317 = vrcp.f32 %v1052_v35  ;;  %v2109_v29 = vadd.f32 1.0, %v2300_v8  ;;  %v566_v43 = vpop.permute.xlu0 %565 }
 0x6ff   :  { %v1053_v32 = vadd.f32 1.0, %v2302_v37  ;;  %v567_v46 = vrot.slane %v566_v43, 4 }
 0x700   :  { %2319 = vrcp.f32 %v2109_v29 }
 0x701   :  { %2321 = vrcp.f32 %v1053_v32  ;;  %v569_v7 = vadd.f32 %v567_v46, %v2591_v9  ;;  %v570_v1 = vadd.f32 %v567_v46, %v2600_v15  ;;  %v571_v60 = vadd.f32 %v567_v46, %v2610_v25 }
 0x702   :  { %v2304_v51 = vpop.eup %2303  ;;  %v572_v42 = vadd.f32 %v567_v46, %v2620_v30  ;;  %v1635_v25 = vadd.f32 %v2847_v23, %v567_v46 }
 0x703   :  { %v2306_v2 = vpop.eup %2305  ;;  %v2110_v28 = vadd.f32 1.0, %v2304_v51  ;;  %v1116_v22 = vrot.slane %v569_v7, 4  ;;  %v1117_v24 = vrot.slane %v570_v1, 4  ;;  %v1118_v37 = vrot.slane %v571_v60, 4 }
 0x704   :  { %v2111_v10 = vadd.f32 1.0, %v2306_v2  ;;  %v1119_v30 = vrot.slane %v572_v42, 4  ;;  %v1636_v51 = vadd.f32 %v2843_v59, %v567_v46  ;;  %v1637_v59 = vadd.f32 %v2855_v31, %v567_v46 }
 0x705   :  { %v2308_v40 = vpop.eup %2307  ;;  %2323 = vrcp.f32 %v2110_v28 }
 0x706   :  { %v2310_v14 = vpop.eup %2309  ;;  %2325 = vrcp.f32 %v2111_v10  ;;  %v1067_v6 = vrot.slane %v2308_v40, %v2584_v5 }
 0x707   :  { %v2312_v44 = vpop.eup %2311  ;;  %v1071_v58 = vrot.slane %v2310_v14, %v2584_v5  ;;  %v2175_v14 = vrot.slane %v1635_v25, 4 }
 0x708   :  { %v2314_v49 = vpop.eup %2313  ;;  %v2112_v18 = vadd.f32 1.0, %v2312_v44  ;;  %1089 = vrot.lane.b32.xlu1 %v1067_v6, %s2342_s4 }
 0x709   :  { %v2113_v45 = vadd.f32 1.0, %v2314_v49  ;;  %1091 = vrot.lane.b32.xlu0 %v1071_v58, %s2342_s4 }
 0x70a   :  { %v2316_v38 = vpop.eup %2315  ;;  %2327 = vrcp.f32 %v2112_v18 }
 0x70b   :  { %v2318_v50 = vpop.eup %2317  ;;  %2329 = vrcp.f32 %v2113_v45  ;;  %v1075_v56 = vrot.slane %v2316_v38, %v2584_v5  ;;  %v1638_v45 = vadd.f32 %v2863_v34, %v567_v46 }
 0x70c   :  { %v1079_v62 = vrot.slane %v2318_v50, %v2584_v5 }
 0x70d   :  { %v2320_v39 = vpop.eup %2319  ;;  %1093 = vrot.lane.b32.xlu1 %v1075_v56, %s2342_s4 }
 0x70e   :  { %v2322_v47 = vpop.eup %2321  ;;  %1095 = vrot.lane.b32.xlu0 %v1079_v62, %s2342_s4  ;;  %v2127_v54 = vrot.slane %v2320_v39, %v2584_v5 }
 0x70f   :  { %v1083_v16 = vrot.slane %v2322_v47, %v2584_v5 }
 0x711   :  { %1097 = vrot.lane.b32.xlu1 %v1083_v16, %s2342_s4 }
 0x712   :  { %v2324_v12 = vpop.eup %2323  ;;  %2149 = vrot.lane.b32.xlu0 %v2127_v54, %s2342_s4  ;;  %v2177_v54 = vrot.slane %v1637_v59, 4 }
 0x713   :  { %v2326_v3 = vpop.eup %2325  ;;  %v2131_v63 = vrot.slane %v2324_v12, %v2584_v5 }
 0x714   :  { %v2135_v0 = vrot.slane %v2326_v3, %v2584_v5  ;;  %v2178_v3 = vrot.slane %v1638_v45, 4 }
 0x715   :  { %2151 = vrot.lane.b32.xlu1 %v2131_v63, %s2342_s4 }
 0x716   :  { %2153 = vrot.lane.b32.xlu0 %v2135_v0, %s2342_s4 }
 0x717   :  { %v2328_v53 = vpop.eup %2327 }
 0x718   :  { %v2330_v52 = vpop.eup %2329  ;;  %v2139_v55 = vrot.slane %v2328_v53, %v2584_v5 }
 0x719   :  { %v2143_v20 = vrot.slane %v2330_v52, %v2584_v5 }
 0x71a   :  { %2155 = vrot.lane.b32.xlu1 %v2139_v55, %s2342_s4 }
 0x71b   :  { %2157 = vrot.lane.b32.xlu0 %v2143_v20, %s2342_s4 }
 0x72a   :  { %v1871_v8 = vpop.f32.mrf.mxu0  ;;  %v1942_v58 = vpop.f32.mrf.mxu1 }
 0x72c   :  { %v1873_v40 = vpop.f32.mrf.mxu0  ;;  %v1944_v39 = vpop.f32.mrf.mxu1 }
 0x77a   :  { %v1090_v27 = vpop.permute.xlu1 %1089 }
 0x77b   :  { %v1092_v4 = vpop.permute.xlu0 %1091 }
 0x77c   :  { %v1100_v36 = vsel %vm1099_vm13, %v1090_v27, %v1092_v4 }
 0x77d   :  { %v1108_v41 = vmul.f32 %v1100_v36, %v2835_v61 }
 0x77f   :  { %v1094_v33 = vpop.permute.xlu1 %1093  ;;  %v1124_v13 = vadd.f32 %v1116_v22, %v1108_v41 }
 0x780   :  { %v1096_v21 = vpop.permute.xlu0 %1095  ;;  %v1101_v5 = vsel %vm1099_vm13, %v1092_v4, %v1094_v33 }
 0x781   :  { %v1102_v26 = vsel %vm1099_vm13, %v1094_v33, %v1096_v21  ;;  %v1109_v48 = vmul.f32 %v1101_v5, %v2839_v57 }
 0x782   :  { %v1110_v9 = vmul.f32 %v1102_v26, %v2837_v17 }
 0x783   :  { %v1125_v15 = vadd.f32 %v1117_v24, %v1109_v48  ;;  %v1098_v11 = vpop.permute.xlu1 %1097 }
 0x784   :  { %v2150_v61 = vpop.permute.xlu0 %2149  ;;  %v1103_v35 = vsel %vm1099_vm13, %v1096_v21, %v1098_v11  ;;  %v1126_v2 = vadd.f32 %v1118_v37, %v1110_v9 }
 0x785   :  { %v1132_v29 = vcombine.low %v1124_v13, %v1125_v15  ;;  %v1111_v32 = vmul.f32 %v1103_v35, %v2841_v19  ;;  %v2176_v19 = vrot.slane %v1636_v51, 4 }
 0x787   :  { %1136 = vst [vmem:[%s3117_s5] sm:$0xff] %v1132_v29  ;;  %v1127_v17 = vadd.f32 %v1119_v30, %v1111_v32  ;;  %v2152_v57 = vpop.permute.xlu1 %2151 }
 0x788   :  { %v2154_v28 = vpop.permute.xlu0 %2153  ;;  %v2159_v10 = vsel %vm1099_vm13, %v2150_v61, %v2152_v57 }
 0x789   :  { %v1133_v23 = vcombine.low %v1126_v2, %v1127_v17  ;;  %v2160_v6 = vsel %vm1099_vm13, %v2152_v57, %v2154_v28  ;;  %v2167_v44 = vmul.f32 %v2159_v10, %v1871_v8 }
 0x78a   :  { %v2168_v49 = vmul.f32 %v2160_v6, %v1873_v40 }
 0x78b   :  { %1137 = vst [vmem:[%s3117_s5 + $0x8] sm:$0xff] %v1133_v23  ;;  %v2183_v18 = vadd.f32 %v2175_v14, %v2167_v44 }
 0x78c   :  { %v2184_v38 = vadd.f32 %v2176_v19, %v2168_v49  ;;  %v2156_v50 = vpop.permute.xlu1 %2155 }
 0x78d   :  { %v2158_v56 = vpop.permute.xlu0 %2157  ;;  %v2161_v62 = vsel %vm1099_vm13, %v2154_v28, %v2156_v50 }
 0x78e   :  { %v2191_v47 = vcombine.low %v2183_v18, %v2184_v38  ;;  %v2162_v16 = vsel %vm1099_vm13, %v2156_v50, %v2158_v56  ;;  %v2169_v12 = vmul.f32 %v2161_v62, %v1942_v58 }
 0x78f   :  { %v2170_v31 = vmul.f32 %v2162_v16, %v1944_v39 }
 0x790   :  { %2252 = vst [vmem:[%s3117_s5 + $0x10] sm:$0xff] %v2191_v47  ;;  %v2185_v63 = vadd.f32 %v2177_v54, %v2169_v12 }
 0x791   :  { %v2186_v0 = vadd.f32 %v2178_v3, %v2170_v31 }
 0x793   :  { %v2192_v34 = vcombine.low %v2185_v63, %v2186_v0 }
 0x795   :  { %2253 = vst [vmem:[%s3117_s5 + $0x18] sm:$0xff] %v2192_v34 }

</bundles_post_ra>
